<compile_context>
chip_gen: v6e
topology: v6e:2x2x1
jax: 0.10.0
libtpu: 0.0.40
codegen_flags: <defaults>
</compile_context>

<pallas_src>
import functools
import math

import jax
import jax.numpy as jnp
from jax import lax
from jax.experimental import pallas as pl
from jax.experimental.pallas import tpu as pltpu


def _mha_kernel(x_ref, o_ref, att_ref, *, num_heads):
    # x_ref: (1, H, T, d)   o_ref: (1, H, T, d)   att_ref: (1, H, T, T)
    xh = x_ref[0]                                   # (H, T, d); used as q, k and v
    scale = 1.0 / math.sqrt(num_heads)              # trace-time constant
    q = xh.astype(jnp.float32) * scale              # fold score scale into q (T*d mul)
    k = xh.astype(jnp.float32)

    # att_score = q @ k^T / sqrt(num_heads): all heads in one batched contraction,
    # contracting the LAST axis of both operands -> no explicit XLU transpose of k.
    s = jnp.einsum('htd,hsd->hts', q, k,
                   preferred_element_type=jnp.float32,
                   precision=lax.Precision.HIGHEST)

    # numerically stable softmax over keys (exact divide; approx reciprocal's
    # error gets amplified by the att@v contraction and broke the out check).
    m = jnp.max(s, axis=-1, keepdims=True)
    e = jnp.exp(s - m)
    denom = jnp.sum(e, axis=-1, keepdims=True)
    p = e / denom

    # TODO(synk): nn.Dropout(att_drop) treated as identity (inference mode).
    # NOTE: att last dim is T=16 (<128 lanes) so these are masked stores; acceptable
    # at this toy size.  For real T, emit a lane-dense (B, T, H*T) slab or switch to
    # flash-style tiling that never materializes (B, H, T, T) at all.
    att_ref[0] = p.astype(att_ref.dtype)

    # x = att_score @ v, head-batched.
    # TODO(synk): for bf16 inputs at real sizes, cast p/v to bf16 here and keep the
    # f32 accumulation (preferred_element_type) for 2x MXU throughput on v6e/v7x.
    o = jnp.einsum('hts,hsd->htd', p, xh.astype(jnp.float32),
                   preferred_element_type=jnp.float32,
                   precision=lax.Precision.HIGHEST)
    o_ref[0] = o.astype(o_ref.dtype)


@functools.partial(jax.jit, static_argnames=("num_heads",))
def multi_head_attention(x, conv_w, conv_b, *, num_heads):
    """x: (B, T, C).  Returns (out (B, T, C), att (B, num_heads, T, T))."""
    # The reference module's 1x1-conv q/k/v results are discarded by forward();
    # not computed here (pure wasted FLOPs/HBM traffic — XLA would DCE it under jit).
    del conv_w, conv_b
    B, T, C = x.shape
    d = C // num_heads

    # rearrange 'b t (d H) -> b H t d' (head index is the fast channel axis).
    # Tiny layout plumbing kept in the jitted wrapper (a few KiB at these shapes).
    # TODO(synk): for large T/C fold the split/recombine into the kernel boundary.
    qkv = x.reshape(B, T, d, num_heads).transpose(0, 3, 1, 2)   # (B, H, T, d)

    kernel = functools.partial(_mha_kernel, num_heads=num_heads)
    out_bhtd, att = pl.pallas_call(
        kernel,
        grid=(B,),                                   # 2 steps, not 16: amortize step overhead
        in_specs=[
            # single qkv input (q == k == v): one DMA, one double-buffer
            pl.BlockSpec((1, num_heads, T, d), lambda b: (b, 0, 0, 0)),
        ],
        out_specs=[
            pl.BlockSpec((1, num_heads, T, d), lambda b: (b, 0, 0, 0)),
            pl.BlockSpec((1, num_heads, T, T), lambda b: (b, 0, 0, 0)),
        ],
        out_shape=[
            jax.ShapeDtypeStruct((B, num_heads, T, d), x.dtype),
            jax.ShapeDtypeStruct((B, num_heads, T, T), jnp.float32),  # att kept f32
        ],
        compiler_params=pltpu.CompilerParams(
            # "parallel" on the batch axis -> each v7x TensorCore takes one batch.
            dimension_semantics=("parallel",)),
    )(qkv)

    # rearrange 'b H t d -> b t (H d)'
    out = out_bhtd.transpose(0, 2, 1, 3).reshape(B, T, num_heads * d)
    return out, att


def _reference(x, num_heads):
    """Pure-jnp reference of the PyTorch forward (dropout = identity)."""
    B, T, C = x.shape
    d = C // num_heads
    q = x.reshape(B, T, d, num_heads).transpose(0, 3, 1, 2)
    s = jnp.einsum('bhtd,bhsd->bhts', q, q,
                   precision=lax.Precision.HIGHEST) / (num_heads ** 0.5)
    p = jax.nn.softmax(s, axis=-1)
    o = jnp.einsum('bhts,bhsd->bhtd', p, q, precision=lax.Precision.HIGHEST)
    o = o.transpose(0, 2, 1, 3).reshape(B, T, C)
    return o, p


if __name__ == "__main__":
    B, in_dim, num_heads = 2, 32, 8
    H = W = 4
    T = H * W                      # 16 tokens

    key = jax.random.PRNGKey(0)
    kx, kw, kb = jax.random.split(key, 3)
    x = jax.random.normal(kx, (B, T, in_dim), dtype=jnp.float32)

    # nn.Conv2d(in_dim, in_dim, kernel_size=1): weight (C,C,1,1), bias (C,)
    conv_w = 0.05 * jax.random.normal(kw, (in_dim, in_dim, 1, 1), dtype=jnp.float32)
    conv_b = 0.01 * jax.random.normal(kb, (in_dim,), dtype=jnp.float32)

    out, att = multi_head_attention(x, conv_w, conv_b, num_heads=num_heads)
    out, att = jax.block_until_ready((out, att))

    ref_out, ref_att = _reference(x, num_heads)
    assert out.shape == (B, T, in_dim)
    assert att.shape == (B, num_heads, T, T)
    err_att = float(jnp.max(jnp.abs(att - ref_att)))
    err_out = float(jnp.max(jnp.abs(out - ref_out)))
    # Exact softmax divide + HIGHEST-precision matmuls -> errors should be ~1e-6;
    # 1e-3 leaves headroom for any MXU rounding differences on real hardware.
    assert jnp.allclose(att, ref_att, atol=1e-3, rtol=1e-3), err_att
    assert jnp.allclose(out, ref_out, atol=1e-3, rtol=1e-3), err_out

    print("KERNEL_OK")
</pallas_src>

<mosaic_0001>
module attributes {stable_mosaic.version = 11 : i64} {
  func.func @_mha_kernel(%arg0: i32, %arg1: memref<1x8x16x4xf32, #tpu.memory_space<vmem>>, %arg2: memref<1x8x16x4xf32, #tpu.memory_space<vmem>>, %arg3: memref<1x8x16x16xf32, #tpu.memory_space<vmem>>) attributes {dimension_semantics = [#tpu.dimension_semantics<parallel>], iteration_bounds = array<i64: 2>, scalar_prefetch = 0 : i64, scratch_operands = 0 : i64, tpu.core_type = #tpu.core_type<tc>, window_params = [{transform_indices = @transform_0, window_bounds = array<i64: 1, 8, 16, 4>}, {transform_indices = @transform_1, window_bounds = array<i64: 1, 8, 16, 4>}, {transform_indices = @transform_2, window_bounds = array<i64: 1, 8, 16, 16>}]} {
    %c0 = arith.constant 0 : index
    %c0_0 = arith.constant 0 : index
    %c0_1 = arith.constant 0 : index
    %c0_2 = arith.constant 0 : index
    %0 = vector.load %arg1[%c0, %c0_0, %c0_1, %c0_2] : memref<1x8x16x4xf32, #tpu.memory_space<vmem>>, vector<1x8x16x4xf32>
    %1 = vector.shape_cast %0 : vector<1x8x16x4xf32> to vector<8x16x4xf32>
    %cst = arith.constant 0.353553385 : f32
    %2 = vector.broadcast %cst : f32 to vector<8x16x4xf32>
    %3 = arith.mulf %1, %2 : vector<8x16x4xf32>
    "tpu.trace_start"() <{level = 10 : i32, message = "htd,hsd->hts"}> : () -> ()
    %cst_3 = arith.constant dense<0.000000e+00> : vector<8x16x16xf32>
    %4 = tpu.matmul %3, %1, %cst_3 {dimension_numbers = #tpu.dot_dimension_numbers<[2], [2], [1], [1], [0, 0, 0, 1, 1, 1], [0], [0]>, precision = #tpu.contract_precision<fp32>} : vector<8x16x4xf32>, vector<8x16x4xf32>, vector<8x16x16xf32> -> vector<8x16x16xf32>
    "tpu.trace_stop"() : () -> ()
    %cst_4 = arith.constant dense<0xFF800000> : vector<8x16xf32>
    %5 = vector.multi_reduction <maximumf>, %4, %cst_4 [2] : vector<8x16x16xf32> to vector<8x16xf32>
    %6 = vector.shape_cast %5 : vector<8x16xf32> to vector<8x16x1xf32>
    %7 = vector.broadcast %6 : vector<8x16x1xf32> to vector<8x16x16xf32>
    %8 = arith.subf %4, %7 : vector<8x16x16xf32>
    %9 = math.exp %8 : vector<8x16x16xf32>
    %cst_5 = arith.constant dense<0.000000e+00> : vector<8x16xf32>
    %10 = vector.multi_reduction <add>, %9, %cst_5 [2] : vector<8x16x16xf32> to vector<8x16xf32>
    %11 = vector.shape_cast %10 : vector<8x16xf32> to vector<8x16x1xf32>
    %12 = vector.broadcast %11 : vector<8x16x1xf32> to vector<8x16x16xf32>
    %13 = arith.divf %9, %12 : vector<8x16x16xf32>
    %c0_6 = arith.constant 0 : index
    %c0_7 = arith.constant 0 : index
    %c0_8 = arith.constant 0 : index
    %c0_9 = arith.constant 0 : index
    %14 = vector.load %arg3[%c0_6, %c0_7, %c0_8, %c0_9] : memref<1x8x16x16xf32, #tpu.memory_space<vmem>>, vector<1x8x16x16xf32>
    %15 = vector.shape_cast %14 : vector<1x8x16x16xf32> to vector<8x16x16xf32>
    %16 = vector.shape_cast %13 : vector<8x16x16xf32> to vector<1x8x16x16xf32>
    tpu.vector_store %arg3[%c0_6, %c0_7, %c0_8, %c0_9], %16 {strides = array<i32>} : memref<1x8x16x16xf32, #tpu.memory_space<vmem>>, vector<1x8x16x16xf32>,
    "tpu.trace_start"() <{level = 10 : i32, message = "hts,hsd->htd"}> : () -> ()
    %cst_10 = arith.constant dense<0.000000e+00> : vector<8x16x4xf32>
    %17 = tpu.matmul %13, %1, %cst_10 {dimension_numbers = #tpu.dot_dimension_numbers<[2], [1], [1], [2], [0, 0, 0, 1, 1, 2], [0], [0]>, precision = #tpu.contract_precision<fp32>} : vector<8x16x16xf32>, vector<8x16x4xf32>, vector<8x16x4xf32> -> vector<8x16x4xf32>
    "tpu.trace_stop"() : () -> ()
    %c0_11 = arith.constant 0 : index
    %c0_12 = arith.constant 0 : index
    %c0_13 = arith.constant 0 : index
    %c0_14 = arith.constant 0 : index
    %18 = vector.load %arg2[%c0_11, %c0_12, %c0_13, %c0_14] : memref<1x8x16x4xf32, #tpu.memory_space<vmem>>, vector<1x8x16x4xf32>
    %19 = vector.shape_cast %18 : vector<1x8x16x4xf32> to vector<8x16x4xf32>
    %20 = vector.shape_cast %17 : vector<8x16x4xf32> to vector<1x8x16x4xf32>
    tpu.vector_store %arg2[%c0_11, %c0_12, %c0_13, %c0_14], %20 {strides = array<i32>} : memref<1x8x16x4xf32, #tpu.memory_space<vmem>>, vector<1x8x16x4xf32>,
    return
  }
  func.func @transform_0(%arg0: i32) -> (i32, i32, i32, i32) {
    %c0_i32 = arith.constant 0 : i32
    %c0_i32_0 = arith.constant 0 : i32
    %c0_i32_1 = arith.constant 0 : i32
    %c0_i32_2 = arith.constant 0 : i32
    return %arg0, %c0_i32, %c0_i32_0, %c0_i32_1 : i32, i32, i32, i32
  }
  func.func @transform_1(%arg0: i32) -> (i32, i32, i32, i32) {
    %c0_i32 = arith.constant 0 : i32
    %c0_i32_0 = arith.constant 0 : i32
    %c0_i32_1 = arith.constant 0 : i32
    %c0_i32_2 = arith.constant 0 : i32
    return %arg0, %c0_i32, %c0_i32_0, %c0_i32_1 : i32, i32, i32, i32
  }
  func.func @transform_2(%arg0: i32) -> (i32, i32, i32, i32) {
    %c0_i32 = arith.constant 0 : i32
    %c0_i32_0 = arith.constant 0 : i32
    %c0_i32_1 = arith.constant 0 : i32
    %c0_i32_2 = arith.constant 0 : i32
    return %arg0, %c0_i32, %c0_i32_0, %c0_i32_1 : i32, i32, i32, i32
  }
}

</mosaic_0001>

<bundles_post_ra>
// kernel: multi_head_attention.1
= control target key start
LH: loop header
LB: loop body
LE: loop exit
PB: predicated region body
PF: predicated region fallthrough
CT: control target
= control target key end

     0   :  { %8 = vsyncpa [#allocation3], 0  ;;  %s11167_s0 = inlined_call_operand.vmem [shape: f32[2,8,16,4], index: 0, kind: input, shape index: {}]   ;;  %s11168_s1 = inlined_call_operand.vmem [shape: f32[2,8,16,4], index: 1, kind: output, shape index: {0}]   ;;  %s11169_s2 = inlined_call_operand.hbm [shape: f32[2,8,16,16], index: 2, kind: output, shape index: {1}]  }
   0x1   :  { %10 = vsyncpa [#allocation3 + $0x1], 0  ;;  %s9956_s9 = smov 0   ;;  %s9958_s10 = smov 0  }
   0x2   :  { %s9960_s11 = smov 0   ;;  %s9962_s12 = smov 0  }
   0x3 LB: > { %s9977_s13 = sadd.s32 4294967295, %s9936_s12   ;;  %s8682_s14 = sadd.s32 4294967294, %s9936_s12   ;;  %s9936_s12 = sphi %s9962_s12, %s11175_s12   ;;  %s9932_s11 = sphi %s9960_s11, %s11174_s11   ;;  %s9928_s10 = sphi %s9958_s10, %s11173_s10   ;;  %s9924_s9 = sphi %s9956_s9, %s11172_s9  }
   0x4   : > { %s9981_s15 = sadd.s32 1, %s9936_s12   ;;  %s75_s16 = sadd.s32 1, %s9932_s11 }
   0x5   : > { %s72_s17 = ssub.s32 %s9936_s12, %s9981_s15  ;;  %p85_p0 = scmp.ne.s32.totalorder %s9932_s11, %s9928_s10 }
   0x6   : > { %p73_p1 = scmp.eq.s32.totalorder %s72_s17, 0  ;;  %p86_p2 = scmp.eq.s32.totalorder %s9977_s13, 1 }
   0x7   : > { %p91_p3 = scmp.ne.s32.totalorder %s9928_s10, %s9924_s9  ;;  %p92_p4 = scmp.eq.s32.totalorder %s8682_s14, 1 }
   0x8   : > { %s9992_s18 = scalar_select %p73_p1, %s9932_s11, %s75_s16  }
   0x9   : > { %p9994_p5 = por %p86_p2, %p85_p0  ;;  %p9998_p6 = por %p92_p4, %p91_p3 }
   0xa   : > { %p8685_p7 = scmp.ge.s32.totalorder %s9936_s12, 1  ;;  %p118_p8 = scmp.lt.s32.totalorder %s9936_s12, 3 }
   0xc   : > { %p119_p9 = pnand %p8685_p7, %p118_p8 }
   0xd   : > { %p145_p10 = scmp.lt.s32.totalorder (!%p119_p9), %s9977_s13, 1  ;;  %s142_s26 = sand.u32 (!%p119_p9), 1, %s9928_s10  }
   0xe   : > { %122 = sbr.rel (%p119_p9) target bundleno = 956 (0x3bc), region = 24  ;;  %s8686_s27 = sshll.u32 (!%p119_p9), %s142_s26, 7 }
   0xf   : > { %s10668_s28 = scalar_lea.vmem (!%p119_p9), [#allocation2], %s8686_s27  ;;  %s8698_s4 = sshll.u32 (!%p119_p9), %s9977_s13, 11 }
  0x10   : > { %s8595_s5 = sshll.u32 (!%p119_p9), %s10668_s28, 4  ;;  %s11097_s8 = scalar_lea.hbm (!%p119_p9), %s11169_s2, %s8698_s4  ;;  %s11099_s5 = int_to_ptr.vmem [resolvable:$true] %s8595_s5 }
  0x11   : > { %s11103_s14 = scalar_lea.sflag (!%p119_p9), [#allocation3], %s142_s26  ;;  %s9938_s16 = smov (!%p119_p9), [#allocation2]  }
  0x12   : > { %s9880_s17 = sshll.u32 (!%p119_p9), %s9938_s16, 4  ;;  %s9881_s17 = int_to_ptr.vmem [resolvable:$false] %s9880_s17 }
  0x13   : > { %s10006_s21 = scalar_select %p145_p10, %s9977_s13, 1  ;;  %vm187_vm0 = vcmask 31744   ;;  %vm4300_vm1 = vcmask 130048  }
  0x14   : > { %s9876_s13 = scalar_lea.vmem %s11099_s5, 2048  ;;  %p9883_p0 = scmp.lt.s32.totalorder %s11099_s5, %s9881_s17 }
  0x15   : > { %s8696_s22 = sshll.u32 %s10006_s21, 7  ;;  %p9877_p11 = scmp.ne.s32.totalorder %s11099_s5, %s9876_s13 }
  0x16   : > { %s10014_s25 = scalar_lea.vmem %s11167_s0, %s8696_s22  ;;  %s11082_s3 = scalar_lea.vmem %s11168_s1, %s8696_s22 }
  0x17   : > { %v10017_v0 = vld [vmem:[%s10014_s25 + $0x8] sm:$0xff]  ;;  %v10020_v1 = vld [vmem:[%s10014_s25] sm:$0xff]  ;;  %v157_v14 = vld [vmem:[%s10014_s25 + $0x10] sm:$0xff]  ;;  %p9878_p12 = pnand %p9877_p11, %p9994_p5  ;;  %s9882_s21 = scalar_lea.vmem %s9881_s17, 4096 }
  0x18   : > { %v198_v2 = vsel %vm187_vm0, %v10017_v0, 0  ;;  %v195_v3 = vsel %vm187_vm0, %v10020_v1, 0  ;;  %v171_v6 = vmul.f32 0.35355338, %v10020_v1  ;;  %v172_v7 = vmul.f32 0.35355338, %v10017_v0  ;;  %p9884_p1 = scmp.lt.s32.totalorder %s9882_s21, %s9876_s13 }
  0x19   : > { %v10026_v4 = vand.u32 4294901760, %v198_v2  ;;  %v10028_v5 = vand.u32 4294901760, %v195_v3  ;;  %v158_v21 = vld [vmem:[%s10014_s25 + $0x18] sm:$0xff]  ;;  %v173_v22 = vmul.f32 0.35355338, %v157_v14  ;;  %v709_v35 = vsel %vm187_vm0, %v157_v14, 0  ;;  %p9879_p13 = pneg %p9878_p12 }
  0x1a   : > { %v189_v9 = vsel %vm187_vm0, %v171_v6, 0  ;;  %v192_v10 = vsel %vm187_vm0, %v172_v7, 0  ;;  %v712_v29 = vsel %vm187_vm0, %v158_v21, 0  ;;  %v174_v33 = vmul.f32 0.35355338, %v158_v21  ;;  %v159_v50 = vld [vmem:[%s10014_s25 + $0x20] sm:$0xff]  ;;  %p9885_p2 = por %p9884_p1, %p9883_p0 }
  0x1b   : > { %9083 = vmatprep.subr.mxu0 %v10026_v4  ;;  %v317_v8 = vsub.f32 %v198_v2, %v10026_v4  ;;  %v324_v11 = vsub.f32 %v195_v3, %v10028_v5  ;;  %v10038_v12 = vand.u32 4294901760, %v189_v9  ;;  %v10040_v13 = vand.u32 4294901760, %v192_v10  ;;  %v160_v55 = vld [vmem:[%s10014_s25 + $0x28] sm:$0xff]  ;;  %v162_v21 = vld [vmem:[%s10014_s25 + $0x38] sm:$0xff] }
  0x1c   : > { %9084 = vmatpush3.xpose.msra.mxu0 %v10026_v4  ;;  %v703_v30 = vsel %vm187_vm0, %v173_v22, 0  ;;  %v10051_v34 = vand.u32 4294901760, %v712_v29  ;;  %v706_v37 = vsel %vm187_vm0, %v174_v33, 0  ;;  %v10058_v38 = vand.u32 4294901760, %v709_v35  ;;  %p9886_p3 = pnand %p9885_p2, %p9879_p13 }
  0x1d   : > { %9085 = vmatprep.subr.mxu0 %v10028_v5  ;;  %v318_v15 = vand.u32 4294901760, %v317_v8  ;;  %v325_v16 = vand.u32 4294901760, %v324_v11  ;;  %v268_v17 = vsub.f32 %v189_v9, %v10038_v12  ;;  %v278_v18 = vsub.f32 %v192_v10, %v10040_v13  ;;  %9094 = vmatprep.mubr.f32.mxu1 %v10038_v12 }
  0x1e   : > { %v10054_v36 = vand.u32 4294901760, %v703_v30  ;;  %v831_v39 = vsub.f32 %v712_v29, %v10051_v34  ;;  %v10065_v41 = vand.u32 4294901760, %v706_v37  ;;  %v838_v43 = vsub.f32 %v709_v35, %v10058_v38 }
  0x1f   : > { %v319_v19 = vsub.f32 %v317_v8, %v318_v15  ;;  %v326_v20 = vsub.f32 %v324_v11, %v325_v16  ;;  %v269_v23 = vand.u32 4294901760, %v268_v17  ;;  %v279_v24 = vand.u32 4294901760, %v278_v18 }
  0x20   : > { %9086 = vmatpush3.xpose.msra.mxu0 %v10028_v5  ;;  %v10062_v40 = vsub.f32 %v703_v30, %v10054_v36  ;;  %v10069_v42 = vand.u32 4294901760, %v831_v39  ;;  %v10074_v45 = vsub.f32 %v706_v37, %v10065_v41  ;;  %v10079_v47 = vand.u32 4294901760, %v838_v43 }
  0x21   : > { %v320_v25 = vand.u32 4294901760, %v319_v19  ;;  %9097 = vmatprep.subr.mxu0 %v317_v8  ;;  %v327_v26 = vand.u32 4294901760, %v326_v20  ;;  %v270_v27 = vsub.f32 %v268_v17, %v269_v23  ;;  %v280_v28 = vsub.f32 %v278_v18, %v279_v24 }
  0x22   : > { %v783_v44 = vand.u32 4294901760, %v10062_v40  ;;  %v833_v46 = vsub.f32 %v831_v39, %v10069_v42  ;;  %v793_v49 = vand.u32 4294901760, %v10074_v45  ;;  %v840_v52 = vsub.f32 %v838_v43, %v10079_v47 }
  0x23   : > { %9090 = vmatprep.subr.mxu1 %v320_v25  ;;  %v271_v31 = vand.u32 4294901760, %v270_v27  ;;  %v281_v32 = vand.u32 4294901760, %v280_v28  ;;  %v175_v56 = vmul.f32 0.35355338, %v159_v50  ;;  %v1226_v58 = vsel %vm187_vm0, %v160_v55, 0 }
  0x24   : > { %9091 = vmatpush3.xpose.msra.mxu1 %v320_v25  ;;  %v784_v48 = vsub.f32 %v10062_v40, %v783_v44  ;;  %v834_v51 = vand.u32 4294901760, %v833_v46  ;;  %v794_v54 = vsub.f32 %v10074_v45, %v793_v49  ;;  %v841_v57 = vand.u32 4294901760, %v840_v52 }
  0x25   : > { %9092 = vmatprep.subr.mxu1 %v327_v26  ;;  %9087 = vmatprep.mubr.f32.mxu0 %v271_v31  ;;  %v1217_v60 = vsel %vm187_vm0, %v175_v56, 0  ;;  %v176_v61 = vmul.f32 0.35355338, %v160_v55  ;;  %v10104_v62 = vand.u32 4294901760, %v1226_v58  ;;  %v1223_v63 = vsel %vm187_vm0, %v159_v50, 0 }
  0x26   : > { %9088 = vmatmul.mubr.f32.vlgmr.msra.gmra.mxu0 %v281_v32  ;;  %v785_v53 = vand.u32 4294901760, %v784_v48  ;;  %v795_v59 = vand.u32 4294901760, %v794_v54  ;;  %v10108_v2 = vand.u32 4294901760, %v1217_v60  ;;  %v178_v27 = vmul.f32 0.35355338, %v162_v21 }
  0x27   : > { %9098 = vmatpush3.xpose.msra.mxu0 %v317_v8  ;;  %9101 = vmatprep.mubr.f32.mxu0 %v268_v17  ;;  %v1220_v3 = vsel %vm187_vm0, %v176_v61, 0 }
  0x28   : > { %9093 = vmatpush3.xpose.msra.mxu1 %v327_v26  ;;  %9099 = vmatprep.subr.mxu0 %v324_v11  ;;  %v10117_v6 = vsub.f32 %v1217_v60, %v10108_v2  ;;  %v10120_v7 = vand.u32 4294901760, %v1220_v3  ;;  %v1734_v31 = vsel %vm187_vm0, %v178_v27, 0 }
  0x29   : > { %9104 = vmatprep.subr.mxu1 %v10026_v4  ;;  %v10184_v35 = vand.u32 4294901760, %v1734_v31 }
  0x2a   : > { %v1297_v10 = vand.u32 4294901760, %v10117_v6 }
  0x2b   : > { %9095 = vmatmul.mubr.f32.vlgmr.msra.gmra.mxu1 %v10040_v13  ;;  %9100 = vmatpush3.xpose.msra.mxu0 %v324_v11  ;;  %v10133_v11 = vsub.f32 %v1220_v3, %v10120_v7 }
  0x2c   : > { %9105 = vmatpush3.xpose.msra.mxu1 %v10026_v4  ;;  %9111 = vmatprep.subr.mxu0 %v318_v15  ;;  %v1298_v14 = vsub.f32 %v10117_v6, %v1297_v10 }
  0x2d   : > { %9106 = vmatprep.subr.mxu1 %v10028_v5  ;;  %9108 = vmatprep.mubr.f32.mxu1 %v269_v23 }
  0x2e   : > { %9102 = vmatmul.mubr.f32.vlgmr.msra.gmra.mxu0 %v278_v18  ;;  %v1299_v19 = vand.u32 4294901760, %v1298_v14 }
  0x2f   : > { %9112 = vmatpush3.xpose.msra.mxu0 %v318_v15  ;;  %9115 = vmatprep.mubr.f32.mxu0 %v10038_v12  ;;  %v1307_v15 = vand.u32 4294901760, %v10133_v11 }
  0x30   : > { %9107 = vmatpush3.xpose.msra.mxu1 %v10028_v5  ;;  %9113 = vmatprep.subr.mxu0 %v325_v16 }
  0x31   : > { %9118 = vmatprep.subr.mxu1 %v10026_v4  ;;  %v1308_v20 = vsub.f32 %v10133_v11, %v1307_v15 }
  0x33   : > { %9109 = vmatmul.mubr.f32.vlgmr.msra.gmra.mxu1 %v279_v24  ;;  %9114 = vmatpush3.xpose.msra.mxu0 %v325_v16  ;;  %v161_v16 = vld [vmem:[%s10014_s25 + $0x30] sm:$0xff]  ;;  %v1740_v24 = vsel %vm187_vm0, %v162_v21, 0  ;;  %v1309_v25 = vand.u32 4294901760, %v1308_v20 }
  0x34   : > { %9119 = vmatpush3.xpose.msra.mxu1 %v10026_v4  ;;  %9125 = vmatprep.subr.mxu0 %v10051_v34  ;;  %v10112_v4 = vand.u32 4294901760, %v1223_v63  ;;  %v177_v22 = vmul.f32 0.35355338, %v161_v16  ;;  %v10168_v28 = vand.u32 4294901760, %v1740_v24  ;;  %v1737_v29 = vsel %vm187_vm0, %v161_v16, 0 }
  0x35   : > { %9120 = vmatprep.subr.mxu1 %v10028_v5  ;;  %9122 = vmatprep.mubr.f32.mxu1 %v10038_v12  ;;  %v10176_v32 = vand.u32 4294901760, %v1737_v29 }
  0x36   : > { %9116 = vmatmul.mubr.f32.vlgmr.msra.gmra.mxu0 %v10040_v13  ;;  %v1352_v9 = vsub.f32 %v1223_v63, %v10112_v4  ;;  %v1731_v26 = vsel %vm187_vm0, %v177_v22, 0  ;;  %v1859_v33 = vsub.f32 %v1740_v24, %v10168_v28 }
  0x37   : > { %9126 = vmatpush3.xpose.msra.mxu0 %v10051_v34  ;;  %9129 = vmatprep.mubr.f32.mxu0 %v785_v53  ;;  %v10172_v30 = vand.u32 4294901760, %v1731_v26  ;;  %v1866_v37 = vsub.f32 %v1737_v29, %v10176_v32 }
  0x38   : > { %9121 = vmatpush3.xpose.msra.mxu1 %v10028_v5  ;;  %9127 = vmatprep.subr.mxu0 %v10058_v38  ;;  %v1345_v5 = vsub.f32 %v1226_v58, %v10104_v62 }
  0x39   : > { %9132 = vmatprep.subr.mxu1 %v834_v51 }
  0x3a   : > { %v10125_v8 = vand.u32 4294901760, %v1345_v5 }
  0x3b   : > { %9123 = vmatmul.mubr.f32.vlgmr.msra.gmra.mxu1 %v10040_v13  ;;  %9128 = vmatpush3.xpose.msra.mxu0 %v10058_v38  ;;  %v10140_v13 = vand.u32 4294901760, %v1352_v9 }
  0x3c   : > { %9133 = vmatpush3.xpose.msra.mxu1 %v834_v51  ;;  %9139 = vmatprep.subr.mxu0 %v831_v39  ;;  %v1347_v12 = vsub.f32 %v1345_v5, %v10125_v8 }
  0x3d   : > { %9134 = vmatprep.subr.mxu1 %v841_v57  ;;  %9136 = vmatprep.mubr.f32.mxu1 %v10054_v36  ;;  %v1354_v18 = vsub.f32 %v1352_v9, %v10140_v13 }
  0x3e   : > { %9130 = vmatmul.mubr.f32.vlgmr.msra.gmra.mxu0 %v795_v59  ;;  %v1348_v17 = vand.u32 4294901760, %v1347_v12 }
  0x3f   : > { %9140 = vmatpush3.xpose.msra.mxu0 %v831_v39  ;;  %9143 = vmatprep.mubr.f32.mxu0 %v10062_v40  ;;  %v1355_v23 = vand.u32 4294901760, %v1354_v18  ;;  %v10197_v39 = vsub.f32 %v1734_v31, %v10184_v35 }
  0x40   : > { %9135 = vmatpush3.xpose.msra.mxu1 %v841_v57  ;;  %9141 = vmatprep.subr.mxu0 %v838_v43 }
  0x41   : > { %9146 = vmatprep.subr.mxu1 %v10051_v34 }
  0x43   : > { %9137 = vmatmul.mubr.f32.vlgmr.msra.gmra.mxu1 %v10065_v41  ;;  %9142 = vmatpush3.xpose.msra.mxu0 %v838_v43  ;;  %v1821_v43 = vand.u32 4294901760, %v10197_v39 }
  0x44   : > { %9147 = vmatpush3.xpose.msra.mxu1 %v10051_v34  ;;  %9153 = vmatprep.subr.mxu0 %v10069_v42 }
  0x45   : > { %9148 = vmatprep.subr.mxu1 %v10058_v38  ;;  %9150 = vmatprep.mubr.f32.mxu1 %v783_v44  ;;  %v163_v44 = vld [vmem:[%s10014_s25 + $0x40] sm:$0xff]  ;;  %v1822_v48 = vsub.f32 %v10197_v39, %v1821_v43 }
  0x46   : > { %9144 = vmatmul.mubr.f32.vlgmr.msra.gmra.mxu0 %v10074_v45  ;;  %v179_v50 = vmul.f32 0.35355338, %v163_v44  ;;  %v2251_v57 = vsel %vm187_vm0, %v163_v44, 0 }
  0x47   : > { %9154 = vmatpush3.xpose.msra.mxu0 %v10069_v42  ;;  %9157 = vmatprep.mubr.f32.mxu0 %v10054_v36  ;;  %v1823_v53 = vand.u32 4294901760, %v1822_v48  ;;  %v10240_v60 = vand.u32 4294901760, %v2251_v57 }
  0x48   : > { %9149 = vmatpush3.xpose.msra.mxu1 %v10058_v38  ;;  %9155 = vmatprep.subr.mxu0 %v10079_v47  ;;  %v2245_v54 = vsel %vm187_vm0, %v179_v50, 0 }
  0x49   : > { %9160 = vmatprep.subr.mxu1 %v10051_v34  ;;  %v10236_v58 = vand.u32 4294901760, %v2245_v54  ;;  %v2380_v3 = vsub.f32 %v2251_v57, %v10240_v60 }
  0x4b   : > { %9151 = vmatmul.mubr.f32.vlgmr.msra.gmra.mxu1 %v793_v49  ;;  %9156 = vmatpush3.xpose.msra.mxu0 %v10079_v47  ;;  %v164_v49 = vld [vmem:[%s10014_s25 + $0x48] sm:$0xff] }
  0x4c   : > { %9161 = vmatpush3.xpose.msra.mxu1 %v10051_v34  ;;  %9167 = vmatprep.subr.mxu0 %v10104_v62  ;;  %v10181_v34 = vsub.f32 %v1731_v26, %v10172_v30  ;;  %v2254_v52 = vsel %vm187_vm0, %v164_v49, 0  ;;  %v180_v55 = vmul.f32 0.35355338, %v164_v49 }
  0x4d   : > { %9162 = vmatprep.subr.mxu1 %v10058_v38  ;;  %9164 = vmatprep.mubr.f32.mxu1 %v10054_v36  ;;  %v10189_v36 = vand.u32 4294901760, %v1859_v33  ;;  %v10232_v56 = vand.u32 4294901760, %v2254_v52 }
  0x4e   : > { %9158 = vmatmul.mubr.f32.vlgmr.msra.gmra.mxu0 %v10065_v41  ;;  %v2248_v59 = vsel %vm187_vm0, %v180_v55, 0 }
  0x4f   : > { %9168 = vmatpush3.xpose.msra.mxu0 %v10104_v62  ;;  %9171 = vmatprep.mubr.f32.mxu0 %v1299_v19  ;;  %v1861_v40 = vsub.f32 %v1859_v33, %v10189_v36  ;;  %v2373_v61 = vsub.f32 %v2254_v52, %v10232_v56  ;;  %v10248_v63 = vand.u32 4294901760, %v2248_v59 }
  0x50   : > { %9163 = vmatpush3.xpose.msra.mxu1 %v10058_v38  ;;  %9169 = vmatprep.subr.mxu0 %v10112_v4  ;;  %v1811_v38 = vand.u32 4294901760, %v10181_v34 }
  0x51   : > { %9174 = vmatprep.subr.mxu1 %v1348_v17  ;;  %v1862_v45 = vand.u32 4294901760, %v1861_v40 }
  0x52   : > { %v1812_v42 = vsub.f32 %v10181_v34, %v1811_v38 }
  0x53   : > { %9165 = vmatmul.mubr.f32.vlgmr.msra.gmra.mxu1 %v10065_v41  ;;  %9170 = vmatpush3.xpose.msra.mxu0 %v10112_v4  ;;  %v10204_v41 = vand.u32 4294901760, %v1866_v37 }
  0x54   : > { %9175 = vmatpush3.xpose.msra.mxu1 %v1348_v17  ;;  %9181 = vmatprep.subr.mxu0 %v1345_v5  ;;  %v1813_v47 = vand.u32 4294901760, %v1812_v42 }
  0x55   : > { %9176 = vmatprep.subr.mxu1 %v1355_v23  ;;  %9178 = vmatprep.mubr.f32.mxu1 %v10108_v2  ;;  %v1868_v46 = vsub.f32 %v1866_v37, %v10204_v41 }
  0x56   : > { %9172 = vmatmul.mubr.f32.vlgmr.msra.gmra.mxu0 %v1309_v25 }
  0x57   : > { %9182 = vmatpush3.xpose.msra.mxu0 %v1345_v5  ;;  %9185 = vmatprep.mubr.f32.mxu0 %v10117_v6  ;;  %v1869_v51 = vand.u32 4294901760, %v1868_v46  ;;  %v10261_v5 = vsub.f32 %v2248_v59, %v10248_v63 }
  0x58   : > { %9177 = vmatpush3.xpose.msra.mxu1 %v1355_v23  ;;  %9183 = vmatprep.subr.mxu0 %v1352_v9 }
  0x59   : > { %9188 = vmatprep.subr.mxu1 %v10104_v62 }
  0x5b   : > { %9179 = vmatmul.mubr.f32.vlgmr.msra.gmra.mxu1 %v10120_v7  ;;  %9184 = vmatpush3.xpose.msra.mxu0 %v1352_v9  ;;  %v2335_v9 = vand.u32 4294901760, %v10261_v5 }
  0x5c   : > { %9189 = vmatpush3.xpose.msra.mxu1 %v10104_v62  ;;  %9195 = vmatprep.subr.mxu0 %v10125_v8 }
  0x5d   : > { %9190 = vmatprep.subr.mxu1 %v10112_v4  ;;  %9192 = vmatprep.mubr.f32.mxu1 %v1297_v10  ;;  %v165_v10 = vld [vmem:[%s10014_s25 + $0x50] sm:$0xff]  ;;  %v2336_v14 = vsub.f32 %v10261_v5, %v2335_v9 }
  0x5e   : > { %9186 = vmatmul.mubr.f32.vlgmr.msra.gmra.mxu0 %v10133_v11  ;;  %v181_v16 = vmul.f32 0.35355338, %v165_v10  ;;  %v2765_v23 = vsel %vm187_vm0, %v165_v10, 0 }
  0x5f   : > { %9196 = vmatpush3.xpose.msra.mxu0 %v10125_v8  ;;  %9199 = vmatprep.mubr.f32.mxu0 %v10108_v2  ;;  %v2337_v19 = vand.u32 4294901760, %v2336_v14  ;;  %v10304_v26 = vand.u32 4294901760, %v2765_v23 }
  0x60   : > { %9191 = vmatpush3.xpose.msra.mxu1 %v10112_v4  ;;  %9197 = vmatprep.subr.mxu0 %v10140_v13  ;;  %v2759_v20 = vsel %vm187_vm0, %v181_v16, 0 }
  0x61   : > { %9202 = vmatprep.subr.mxu1 %v10104_v62  ;;  %v10300_v24 = vand.u32 4294901760, %v2759_v20  ;;  %v2894_v31 = vsub.f32 %v2765_v23, %v10304_v26 }
  0x63   : > { %9193 = vmatmul.mubr.f32.vlgmr.msra.gmra.mxu1 %v1307_v15  ;;  %9198 = vmatpush3.xpose.msra.mxu0 %v10140_v13  ;;  %v166_v15 = vld [vmem:[%s10014_s25 + $0x58] sm:$0xff] }
  0x64   : > { %9203 = vmatpush3.xpose.msra.mxu1 %v10104_v62  ;;  %9209 = vmatprep.subr.mxu0 %v10168_v28  ;;  %v10245_v62 = vsub.f32 %v2245_v54, %v10236_v58  ;;  %v2768_v18 = vsel %vm187_vm0, %v166_v15, 0  ;;  %v182_v21 = vmul.f32 0.35355338, %v166_v15 }
  0x65   : > { %9204 = vmatprep.subr.mxu1 %v10112_v4  ;;  %9206 = vmatprep.mubr.f32.mxu1 %v10108_v2  ;;  %v10253_v2 = vand.u32 4294901760, %v2373_v61  ;;  %v10296_v22 = vand.u32 4294901760, %v2768_v18 }
  0x66   : > { %9200 = vmatmul.mubr.f32.vlgmr.msra.gmra.mxu0 %v10120_v7  ;;  %v2762_v25 = vsel %vm187_vm0, %v182_v21, 0 }
  0x67   : > { %9210 = vmatpush3.xpose.msra.mxu0 %v10168_v28  ;;  %9213 = vmatprep.mubr.f32.mxu0 %v1813_v47  ;;  %v2375_v6 = vsub.f32 %v2373_v61, %v10253_v2  ;;  %v2887_v27 = vsub.f32 %v2768_v18, %v10296_v22  ;;  %v10312_v29 = vand.u32 4294901760, %v2762_v25 }
  0x68   : > { %9205 = vmatpush3.xpose.msra.mxu1 %v10112_v4  ;;  %9211 = vmatprep.subr.mxu0 %v10176_v32  ;;  %v2325_v4 = vand.u32 4294901760, %v10245_v62 }
  0x69   : > { %9216 = vmatprep.subr.mxu1 %v1862_v45  ;;  %v2376_v11 = vand.u32 4294901760, %v2375_v6 }
  0x6a   : > { %v2326_v8 = vsub.f32 %v10245_v62, %v2325_v4 }
  0x6b   : > { %9207 = vmatmul.mubr.f32.vlgmr.msra.gmra.mxu1 %v10120_v7  ;;  %9212 = vmatpush3.xpose.msra.mxu0 %v10176_v32  ;;  %v10268_v7 = vand.u32 4294901760, %v2380_v3 }
  0x6c   : > { %9217 = vmatpush3.xpose.msra.mxu1 %v1862_v45  ;;  %9223 = vmatprep.subr.mxu0 %v1859_v33  ;;  %v2327_v13 = vand.u32 4294901760, %v2326_v8 }
  0x6d   : > { %9218 = vmatprep.subr.mxu1 %v1869_v51  ;;  %9220 = vmatprep.mubr.f32.mxu1 %v10172_v30  ;;  %v2382_v12 = vsub.f32 %v2380_v3, %v10268_v7 }
  0x6e   : > { %9214 = vmatmul.mubr.f32.vlgmr.msra.gmra.mxu0 %v1823_v53 }
  0x6f   : > { %9224 = vmatpush3.xpose.msra.mxu0 %v1859_v33  ;;  %9227 = vmatprep.mubr.f32.mxu0 %v10181_v34  ;;  %v2383_v17 = vand.u32 4294901760, %v2382_v12  ;;  %v10325_v33 = vsub.f32 %v2762_v25, %v10312_v29 }
  0x70   : > { %9219 = vmatpush3.xpose.msra.mxu1 %v1869_v51  ;;  %9225 = vmatprep.subr.mxu0 %v1866_v37 }
  0x71   : > { %9230 = vmatprep.subr.mxu1 %v10168_v28 }
  0x73   : > { %9221 = vmatmul.mubr.f32.vlgmr.msra.gmra.mxu1 %v10184_v35  ;;  %9226 = vmatpush3.xpose.msra.mxu0 %v1866_v37  ;;  %v2849_v37 = vand.u32 4294901760, %v10325_v33 }
  0x74   : > { %9231 = vmatpush3.xpose.msra.mxu1 %v10168_v28  ;;  %9237 = vmatprep.subr.mxu0 %v10189_v36 }
  0x75   : > { %9232 = vmatprep.subr.mxu1 %v10176_v32  ;;  %9234 = vmatprep.mubr.f32.mxu1 %v1811_v38  ;;  %v167_v38 = vld [vmem:[%s10014_s25 + $0x60] sm:$0xff]  ;;  %v2850_v42 = vsub.f32 %v10325_v33, %v2849_v37 }
  0x76   : > { %9228 = vmatmul.mubr.f32.vlgmr.msra.gmra.mxu0 %v10197_v39  ;;  %v183_v44 = vmul.f32 0.35355338, %v167_v38  ;;  %v3279_v51 = vsel %vm187_vm0, %v167_v38, 0  ;;  %v10475_v38 = vand.u32 4294901760, %v10017_v0 }
  0x77   : > { %9238 = vmatpush3.xpose.msra.mxu0 %v10189_v36  ;;  %9241 = vmatprep.mubr.f32.mxu0 %v10172_v30  ;;  %v2851_v47 = vand.u32 4294901760, %v2850_v42  ;;  %v10368_v54 = vand.u32 4294901760, %v3279_v51 }
  0x78   : > { %9233 = vmatpush3.xpose.msra.mxu1 %v10176_v32  ;;  %9239 = vmatprep.subr.mxu0 %v10204_v41  ;;  %v3273_v48 = vsel %vm187_vm0, %v183_v44, 0 }
  0x79   : > { %9244 = vmatprep.subr.mxu1 %v10168_v28  ;;  %v10364_v52 = vand.u32 4294901760, %v3273_v48  ;;  %v3408_v59 = vsub.f32 %v3279_v51, %v10368_v54 }
  0x7b   : > { %9235 = vmatmul.mubr.f32.vlgmr.msra.gmra.mxu1 %v1821_v43  ;;  %9240 = vmatpush3.xpose.msra.mxu0 %v10204_v41  ;;  %v168_v43 = vld [vmem:[%s10014_s25 + $0x68] sm:$0xff] }
  0x7c   : > { %9245 = vmatpush3.xpose.msra.mxu1 %v10168_v28  ;;  %9251 = vmatprep.subr.mxu0 %v10232_v56  ;;  %v10309_v28 = vsub.f32 %v2759_v20, %v10300_v24  ;;  %v3282_v46 = vsel %vm187_vm0, %v168_v43, 0  ;;  %v184_v49 = vmul.f32 0.35355338, %v168_v43 }
  0x7d   : > { %9246 = vmatprep.subr.mxu1 %v10176_v32  ;;  %9248 = vmatprep.mubr.f32.mxu1 %v10172_v30  ;;  %v10317_v30 = vand.u32 4294901760, %v2887_v27  ;;  %v10360_v50 = vand.u32 4294901760, %v3282_v46 }
  0x7e   : > { %9242 = vmatmul.mubr.f32.vlgmr.msra.gmra.mxu0 %v10184_v35  ;;  %v3276_v53 = vsel %vm187_vm0, %v184_v49, 0 }
  0x7f   : > { %9252 = vmatpush3.xpose.msra.mxu0 %v10232_v56  ;;  %9255 = vmatprep.mubr.f32.mxu0 %v2327_v13  ;;  %v2889_v34 = vsub.f32 %v2887_v27, %v10317_v30  ;;  %v3401_v55 = vsub.f32 %v3282_v46, %v10360_v50  ;;  %v10376_v57 = vand.u32 4294901760, %v3276_v53 }
  0x80   : > { %9247 = vmatpush3.xpose.msra.mxu1 %v10176_v32  ;;  %9253 = vmatprep.subr.mxu0 %v10240_v60  ;;  %v2839_v32 = vand.u32 4294901760, %v10309_v28 }
  0x81   : > { %9258 = vmatprep.subr.mxu1 %v2376_v11  ;;  %v2890_v39 = vand.u32 4294901760, %v2889_v34 }
  0x82   : > { %v2840_v36 = vsub.f32 %v10309_v28, %v2839_v32 }
  0x83   : > { %9249 = vmatmul.mubr.f32.vlgmr.msra.gmra.mxu1 %v10184_v35  ;;  %9254 = vmatpush3.xpose.msra.mxu0 %v10240_v60  ;;  %v10332_v35 = vand.u32 4294901760, %v2894_v31 }
  0x84   : > { %9259 = vmatpush3.xpose.msra.mxu1 %v2376_v11  ;;  %9265 = vmatprep.subr.mxu0 %v2373_v61  ;;  %v2841_v41 = vand.u32 4294901760, %v2840_v36 }
  0x85   : > { %9260 = vmatprep.subr.mxu1 %v2383_v17  ;;  %9262 = vmatprep.mubr.f32.mxu1 %v10236_v58  ;;  %v2896_v40 = vsub.f32 %v2894_v31, %v10332_v35 }
  0x86   : > { %9256 = vmatmul.mubr.f32.vlgmr.msra.gmra.mxu0 %v2337_v19 }
  0x87   : > { %9266 = vmatpush3.xpose.msra.mxu0 %v2373_v61  ;;  %9269 = vmatprep.mubr.f32.mxu0 %v10245_v62  ;;  %v2897_v45 = vand.u32 4294901760, %v2896_v40  ;;  %v10389_v61 = vsub.f32 %v3276_v53, %v10376_v57 }
  0x88   : > { %9261 = vmatpush3.xpose.msra.mxu1 %v2383_v17  ;;  %9267 = vmatprep.subr.mxu0 %v2380_v3 }
  0x89   : > { %9272 = vmatprep.subr.mxu1 %v10232_v56 }
  0x8b   : > { %9263 = vmatmul.mubr.f32.vlgmr.msra.gmra.mxu1 %v10248_v63  ;;  %9268 = vmatpush3.xpose.msra.mxu0 %v2380_v3  ;;  %v3363_v3 = vand.u32 4294901760, %v10389_v61 }
  0x8c   : > { %9273 = vmatpush3.xpose.msra.mxu1 %v10232_v56  ;;  %9279 = vmatprep.subr.mxu0 %v10253_v2 }
  0x8d   : > { %9274 = vmatprep.subr.mxu1 %v10240_v60  ;;  %9276 = vmatprep.mubr.f32.mxu1 %v2325_v4  ;;  %v169_v4 = vld [vmem:[%s10014_s25 + $0x70] sm:$0xff]  ;;  %v3364_v8 = vsub.f32 %v10389_v61, %v3363_v3 }
  0x8e   : > { %9270 = vmatmul.mubr.f32.vlgmr.msra.gmra.mxu0 %v10261_v5  ;;  %v185_v10 = vmul.f32 0.35355338, %v169_v4  ;;  %v3793_v17 = vsel %vm187_vm0, %v169_v4, 0 }
  0x8f   : > { %9280 = vmatpush3.xpose.msra.mxu0 %v10253_v2  ;;  %9283 = vmatprep.mubr.f32.mxu0 %v10236_v58  ;;  %v3365_v13 = vand.u32 4294901760, %v3364_v8  ;;  %v10432_v20 = vand.u32 4294901760, %v3793_v17 }
  0x90   : > { %9275 = vmatpush3.xpose.msra.mxu1 %v10240_v60  ;;  %9281 = vmatprep.subr.mxu0 %v10268_v7  ;;  %v3787_v14 = vsel %vm187_vm0, %v185_v10, 0 }
  0x91   : > { %9286 = vmatprep.subr.mxu1 %v10232_v56  ;;  %v10428_v18 = vand.u32 4294901760, %v3787_v14  ;;  %v3922_v25 = vsub.f32 %v3793_v17, %v10432_v20 }
  0x93   : > { %9277 = vmatmul.mubr.f32.vlgmr.msra.gmra.mxu1 %v2335_v9  ;;  %9282 = vmatpush3.xpose.msra.mxu0 %v10268_v7  ;;  %v170_v9 = vld [vmem:[%s10014_s25 + $0x78] sm:$0xff] }
  0x94   : > { %9287 = vmatpush3.xpose.msra.mxu1 %v10232_v56  ;;  %9293 = vmatprep.subr.mxu0 %v10296_v22  ;;  %v10373_v56 = vsub.f32 %v3273_v48, %v10364_v52  ;;  %v3796_v12 = vsel %vm187_vm0, %v170_v9, 0  ;;  %v186_v15 = vmul.f32 0.35355338, %v170_v9 }
  0x95   : > { %9288 = vmatprep.subr.mxu1 %v10240_v60  ;;  %9290 = vmatprep.mubr.f32.mxu1 %v10236_v58  ;;  %v10381_v58 = vand.u32 4294901760, %v3401_v55  ;;  %v10424_v16 = vand.u32 4294901760, %v3796_v12 }
  0x96   : > { %9284 = vmatmul.mubr.f32.vlgmr.msra.gmra.mxu0 %v10248_v63  ;;  %v3790_v19 = vsel %vm187_vm0, %v186_v15, 0 }
  0x97   : > { %9294 = vmatpush3.xpose.msra.mxu0 %v10296_v22  ;;  %9297 = vmatprep.mubr.f32.mxu0 %v2841_v41  ;;  %v3403_v62 = vsub.f32 %v3401_v55, %v10381_v58  ;;  %v3915_v21 = vsub.f32 %v3796_v12, %v10424_v16  ;;  %v10438_v23 = vand.u32 4294901760, %v3790_v19 }
  0x98   : > { %9289 = vmatpush3.xpose.msra.mxu1 %v10240_v60  ;;  %9295 = vmatprep.subr.mxu0 %v10304_v26  ;;  %v3353_v60 = vand.u32 4294901760, %v10373_v56 }
  0x99   : > { %9300 = vmatprep.subr.mxu1 %v2890_v39  ;;  %v3404_v5 = vand.u32 4294901760, %v3403_v62 }
  0x9a   : > { %v3354_v2 = vsub.f32 %v10373_v56, %v3353_v60 }
  0x9b   : > { %9291 = vmatmul.mubr.f32.vlgmr.msra.gmra.mxu1 %v10248_v63  ;;  %9296 = vmatpush3.xpose.msra.mxu0 %v10304_v26  ;;  %v10396_v63 = vand.u32 4294901760, %v3408_v59 }
  0x9c   : > { %9301 = vmatpush3.xpose.msra.mxu1 %v2890_v39  ;;  %9307 = vmatprep.subr.mxu0 %v2887_v27  ;;  %v3355_v7 = vand.u32 4294901760, %v3354_v2  ;;  %v10482_v39 = vand.u32 4294901760, %v10020_v1 }
  0x9d   : > { %9302 = vmatprep.subr.mxu1 %v2897_v45  ;;  %9304 = vmatprep.mubr.f32.mxu1 %v10300_v24  ;;  %v3410_v6 = vsub.f32 %v3408_v59, %v10396_v63 }
  0x9e   : > { %9298 = vmatmul.mubr.f32.vlgmr.msra.gmra.mxu0 %v2851_v47 }
  0x9f   : > { %9308 = vmatpush3.xpose.msra.mxu0 %v2887_v27  ;;  %9311 = vmatprep.mubr.f32.mxu0 %v10309_v28  ;;  %v3411_v11 = vand.u32 4294901760, %v3410_v6  ;;  %v3876_v27 = vsub.f32 %v3790_v19, %v10438_v23 }
  0xa0   : > { %9303 = vmatpush3.xpose.msra.mxu1 %v2897_v45  ;;  %9309 = vmatprep.subr.mxu0 %v2894_v31 }
  0xa1   : > { %9314 = vmatprep.subr.mxu1 %v10296_v22 }
  0xa3   : > { %9305 = vmatmul.mubr.f32.vlgmr.msra.gmra.mxu1 %v10312_v29  ;;  %9310 = vmatpush3.xpose.msra.mxu0 %v2894_v31  ;;  %v3877_v31 = vand.u32 4294901760, %v3876_v27 }
  0xa4   : > { %9315 = vmatpush3.xpose.msra.mxu1 %v10296_v22  ;;  %9321 = vmatprep.subr.mxu0 %v10317_v30 }
  0xa5   : > { %9316 = vmatprep.subr.mxu1 %v10304_v26  ;;  %9318 = vmatprep.mubr.f32.mxu1 %v2839_v32 }
  0xa6   : > { %9312 = vmatmul.mubr.f32.vlgmr.msra.gmra.mxu0 %v10325_v33 }
  0xa7   : > { %9322 = vmatpush3.xpose.msra.mxu0 %v10317_v30  ;;  %9325 = vmatprep.mubr.f32.mxu0 %v10300_v24 }
  0xa8   : > { %9317 = vmatpush3.xpose.msra.mxu1 %v10304_v26  ;;  %9323 = vmatprep.subr.mxu0 %v10332_v35 }
  0xa9   : > { %9328 = vmatprep.subr.mxu1 %v10296_v22 }
  0xab   : > { %9319 = vmatmul.mubr.f32.vlgmr.msra.gmra.mxu1 %v2849_v37  ;;  %9324 = vmatpush3.xpose.msra.mxu0 %v10332_v35  ;;  %v3878_v35 = vsub.f32 %v3876_v27, %v3877_v31 }
  0xac   : > { %9329 = vmatpush3.xpose.msra.mxu1 %v10296_v22  ;;  %9335 = vmatprep.subr.mxu0 %v10360_v50  ;;  %v3866_v22 = vsub.f32 %v3787_v14, %v10428_v18 }
  0xad   : > { %9330 = vmatprep.subr.mxu1 %v10304_v26  ;;  %9332 = vmatprep.mubr.f32.mxu1 %v10300_v24  ;;  %v3916_v24 = vand.u32 4294901760, %v3915_v21  ;;  %v3879_v37 = vand.u32 4294901760, %v3878_v35 }
  0xae   : > { %9326 = vmatmul.mubr.f32.vlgmr.msra.gmra.mxu0 %v10312_v29 }
  0xaf   : > { %9336 = vmatpush3.xpose.msra.mxu0 %v10360_v50  ;;  %9339 = vmatprep.mubr.f32.mxu0 %v3355_v7  ;;  %v3917_v28 = vsub.f32 %v3915_v21, %v3916_v24 }
  0xb0   : > { %9331 = vmatpush3.xpose.msra.mxu1 %v10304_v26  ;;  %9337 = vmatprep.subr.mxu0 %v10368_v54  ;;  %v3867_v26 = vand.u32 4294901760, %v3866_v22 }
  0xb1   : > { %9342 = vmatprep.subr.mxu1 %v3404_v5  ;;  %v3918_v32 = vand.u32 4294901760, %v3917_v28 }
  0xb2   : > { %v3868_v30 = vsub.f32 %v3866_v22, %v3867_v26 }
  0xb3   : > { %9333 = vmatmul.mubr.f32.vlgmr.msra.gmra.mxu1 %v10312_v29  ;;  %9338 = vmatpush3.xpose.msra.mxu0 %v10368_v54  ;;  %v3923_v29 = vand.u32 4294901760, %v3922_v25 }
  0xb4   : > { %9343 = vmatpush3.xpose.msra.mxu1 %v3404_v5  ;;  %9349 = vmatprep.subr.mxu0 %v3401_v55  ;;  %v3869_v34 = vand.u32 4294901760, %v3868_v30 }
  0xb5   : > { %9344 = vmatprep.subr.mxu1 %v3411_v11  ;;  %9346 = vmatprep.mubr.f32.mxu1 %v10364_v52  ;;  %v3924_v33 = vsub.f32 %v3922_v25, %v3923_v29 }
  0xb6   : > { %9340 = vmatmul.mubr.f32.vlgmr.msra.gmra.mxu0 %v3365_v13 }
  0xb7   : > { %9350 = vmatpush3.xpose.msra.mxu0 %v3401_v55  ;;  %9353 = vmatprep.mubr.f32.mxu0 %v10373_v56  ;;  %v3925_v36 = vand.u32 4294901760, %v3924_v33 }
  0xb8   : > { %9345 = vmatpush3.xpose.msra.mxu1 %v3411_v11  ;;  %9351 = vmatprep.subr.mxu0 %v3408_v59 }
  0xb9   : > { %9356 = vmatprep.subr.mxu1 %v10360_v50 }
  0xbb   : > { %9347 = vmatmul.mubr.f32.vlgmr.msra.gmra.mxu1 %v10376_v57  ;;  %9352 = vmatpush3.xpose.msra.mxu0 %v3408_v59 }
  0xbc   : > { %9357 = vmatpush3.xpose.msra.mxu1 %v10360_v50  ;;  %9363 = vmatprep.subr.mxu0 %v10381_v58 }
  0xbd   : > { %9358 = vmatprep.subr.mxu1 %v10368_v54  ;;  %9360 = vmatprep.mubr.f32.mxu1 %v3353_v60 }
  0xbe   : > { %9354 = vmatmul.mubr.f32.vlgmr.msra.gmra.mxu0 %v10389_v61 }
  0xbf   : > { %9364 = vmatpush3.xpose.msra.mxu0 %v10381_v58  ;;  %9367 = vmatprep.mubr.f32.mxu0 %v10364_v52 }
  0xc0   : > { %9359 = vmatpush3.xpose.msra.mxu1 %v10368_v54  ;;  %9365 = vmatprep.subr.mxu0 %v10396_v63 }
  0xc1   : > { %9370 = vmatprep.subr.mxu1 %v10360_v50 }
  0xc3   : > { %9361 = vmatmul.mubr.f32.vlgmr.msra.gmra.mxu1 %v3363_v3  ;;  %9366 = vmatpush3.xpose.msra.mxu0 %v10396_v63 }
  0xc4   : > { %9371 = vmatpush3.xpose.msra.mxu1 %v10360_v50  ;;  %9377 = vmatprep.subr.mxu0 %v10424_v16 }
  0xc5   : > { %9372 = vmatprep.subr.mxu1 %v10368_v54  ;;  %9374 = vmatprep.mubr.f32.mxu1 %v10364_v52 }
  0xc6   : > { %9368 = vmatmul.mubr.f32.vlgmr.msra.gmra.mxu0 %v10376_v57 }
  0xc7   : > { %9378 = vmatpush3.xpose.msra.mxu0 %v10424_v16  ;;  %9381 = vmatprep.mubr.f32.mxu0 %v3869_v34 }
  0xc8   : > { %9373 = vmatpush3.xpose.msra.mxu1 %v10368_v54  ;;  %9379 = vmatprep.subr.mxu0 %v10432_v20 }
  0xc9   : > { %9384 = vmatprep.subr.mxu1 %v3918_v32 }
  0xcb   : > { %9375 = vmatmul.mubr.f32.vlgmr.msra.gmra.mxu1 %v10376_v57  ;;  %9380 = vmatpush3.xpose.msra.mxu0 %v10432_v20 }
  0xcc   : > { %9385 = vmatpush3.xpose.msra.mxu1 %v3918_v32  ;;  %9391 = vmatprep.subr.mxu0 %v3915_v21 }
  0xcd   : > { %9386 = vmatprep.subr.mxu1 %v3925_v36  ;;  %9388 = vmatprep.mubr.f32.mxu1 %v10428_v18 }
  0xce   : > { %9382 = vmatmul.mubr.f32.vlgmr.msra.gmra.mxu0 %v3879_v37 }
  0xcf   : > { %9392 = vmatpush3.xpose.msra.mxu0 %v3915_v21  ;;  %9395 = vmatprep.mubr.f32.mxu0 %v3866_v22 }
  0xd0   : > { %9387 = vmatpush3.xpose.msra.mxu1 %v3925_v36  ;;  %9393 = vmatprep.subr.mxu0 %v3922_v25 }
  0xd1   : > { %9398 = vmatprep.subr.mxu1 %v10424_v16 }
  0xd3   : > { %9389 = vmatmul.mubr.f32.vlgmr.msra.gmra.mxu1 %v10438_v23  ;;  %9394 = vmatpush3.xpose.msra.mxu0 %v3922_v25 }
  0xd4   : > { %9399 = vmatpush3.xpose.msra.mxu1 %v10424_v16  ;;  %9405 = vmatprep.subr.mxu0 %v3916_v24 }
  0xd5   : > { %9400 = vmatprep.subr.mxu1 %v10432_v20  ;;  %9402 = vmatprep.mubr.f32.mxu1 %v3867_v26 }
  0xd6   : > { %9396 = vmatmul.mubr.f32.vlgmr.msra.gmra.mxu0 %v3876_v27 }
  0xd7   : > { %9406 = vmatpush3.xpose.msra.mxu0 %v3916_v24  ;;  %9409 = vmatprep.mubr.f32.mxu0 %v10428_v18 }
  0xd8   : > { %9401 = vmatpush3.xpose.msra.mxu1 %v10432_v20  ;;  %9407 = vmatprep.subr.mxu0 %v3923_v29 }
  0xd9   : > { %9412 = vmatprep.subr.mxu1 %v10424_v16 }
  0xdb   : > { %9403 = vmatmul.mubr.f32.vlgmr.msra.gmra.mxu1 %v3877_v31  ;;  %9408 = vmatpush3.xpose.msra.mxu0 %v3923_v29 }
  0xdc   : > { %9413 = vmatpush3.xpose.msra.mxu1 %v10424_v16  ;;  %9416 = vmatprep.mubr.f32.mxu1 %v10428_v18 }
  0xdd   : > { %9414 = vmatprep.subr.mxu1 %v10432_v20  ;;  %9419 = vmatprep.subr.mxu0 %v10475_v38 }
  0xde   : > { %9410 = vmatmul.mubr.f32.vlgmr.msra.gmra.mxu0 %v10438_v23 }
  0xdf   : > { %9420 = vmatpush3.msra.mxu0 %v10475_v38 }
  0xe0   : > { %9415 = vmatpush3.xpose.msra.mxu1 %v10432_v20  ;;  %9421 = vmatprep.subr.mxu0 %v10482_v39 }
  0xe1   : > { %9422 = vmatpush3.msra.mxu0 %v10482_v39 }
  0xe3   : > { %9417 = vmatmul.mubr.f32.vlgmr.msra.gmra.mxu1 %v10438_v23 }
  0xe6   : > { %v9089_v0 = vpop.f32.mrf.mxu0 }
  0xe8   : > { %v273_v40 = vpop.f32.mrf.mxu0 }
  0xeb   : > { %v9096_v41 = vpop.f32.mrf.mxu1 }
  0xec   : > { %v371_v46 = vadd.f32 %v9096_v41, %v9089_v0 }
  0xed   : > { %v364_v42 = vpop.f32.mrf.mxu1 }
  0xee   : > { %v9103_v43 = vpop.f32.mrf.mxu0  ;;  %v365_v44 = vadd.f32 %v364_v42, %v273_v40 }
  0xef   : > { %v454_v50 = vadd.f32 %v9103_v43, %v371_v46 }
  0xf0   : > { %v446_v1 = vpop.f32.mrf.mxu0 }
  0xf1   : > { %v447_v48 = vadd.f32 %v446_v1, %v365_v44 }
  0xf3   : > { %v9110_v45 = vpop.f32.mrf.mxu1 }
  0xf4   : > { %v537_v53 = vadd.f32 %v9110_v45, %v454_v50 }
  0xf5   : > { %v528_v47 = vpop.f32.mrf.mxu1 }
  0xf6   : > { %v9117_v49 = vpop.f32.mrf.mxu0  ;;  %v529_v51 = vadd.f32 %v528_v47, %v447_v48 }
  0xf7   : > { %v620_v57 = vadd.f32 %v9117_v49, %v537_v53 }
  0xf8   : > { %v613_v52 = vpop.f32.mrf.mxu0 }
  0xf9   : > { %v614_v55 = vadd.f32 %v613_v52, %v529_v51 }
  0xfb   : > { %v9124_v54 = vpop.f32.mrf.mxu1 }
  0xfc   : > { %v10492_v60 = vadd.f32 %v9124_v54, %v620_v57 }
  0xfd   : > { %v692_v56 = vpop.f32.mrf.mxu1 }
  0xfe   : > { %v10490_v58 = vadd.f32 %v692_v56, %v614_v55  ;;  %v9131_v59 = vpop.f32.mrf.mxu0  ;;  %v4304_v2 = vsel %vm4300_vm1, %v10492_v60, -inf }
 0x100   : > { %v4301_v61 = vsel %vm4300_vm1, %v10490_v58, -inf  ;;  %v787_v62 = vpop.f32.mrf.mxu0 }
 0x101   : > { %4302 = vmax.xlane.f32.xlu0 %v4301_v61 }
 0x103   : > { %v9138_v63 = vpop.f32.mrf.mxu1 }
 0x104   : > { %v885_v8 = vadd.f32 %v9138_v63, %v9131_v59 }
 0x105   : > { %4305 = vmax.xlane.f32.xlu0 %v4304_v2  ;;  %v878_v3 = vpop.f32.mrf.mxu1 }
 0x106   : > { %v9145_v4 = vpop.f32.mrf.mxu0  ;;  %v879_v5 = vadd.f32 %v878_v3, %v787_v62 }
 0x107   : > { %v968_v12 = vadd.f32 %v9145_v4, %v885_v8 }
 0x108   : > { %v960_v6 = vpop.f32.mrf.mxu0 }
 0x109   : > { %v961_v10 = vadd.f32 %v960_v6, %v879_v5 }
 0x10b   : > { %v9152_v7 = vpop.f32.mrf.mxu1 }
 0x10c   : > { %v1051_v15 = vadd.f32 %v9152_v7, %v968_v12 }
 0x10d   : > { %v1042_v9 = vpop.f32.mrf.mxu1 }
 0x10e   : > { %v9159_v11 = vpop.f32.mrf.mxu0  ;;  %v1043_v13 = vadd.f32 %v1042_v9, %v961_v10 }
 0x10f   : > { %v1134_v19 = vadd.f32 %v9159_v11, %v1051_v15 }
 0x110   : > { %v1127_v14 = vpop.f32.mrf.mxu0 }
 0x111   : > { %v1128_v17 = vadd.f32 %v1127_v14, %v1043_v13 }
 0x113   : > { %v9166_v16 = vpop.f32.mrf.mxu1 }
 0x114   : > { %v10500_v22 = vadd.f32 %v9166_v16, %v1134_v19 }
 0x115   : > { %v1206_v18 = vpop.f32.mrf.mxu1 }
 0x116   : > { %v10498_v20 = vadd.f32 %v1206_v18, %v1128_v17  ;;  %v9173_v21 = vpop.f32.mrf.mxu0  ;;  %v4310_v26 = vsel %vm4300_vm1, %v10500_v22, -inf }
 0x118   : > { %v4307_v23 = vsel %vm4300_vm1, %v10498_v20, -inf  ;;  %v1301_v24 = vpop.f32.mrf.mxu0 }
 0x119   : > { %4308 = vmax.xlane.f32.xlu1 %v4307_v23 }
 0x11b   : > { %v9180_v25 = vpop.f32.mrf.mxu1 }
 0x11c   : > { %v1399_v29 = vadd.f32 %v9180_v25, %v9173_v21 }
 0x11d   : > { %4311 = vmax.xlane.f32.xlu1 %v4310_v26  ;;  %v1392_v27 = vpop.f32.mrf.mxu1 }
 0x11e   : > { %v9187_v28 = vpop.f32.mrf.mxu0  ;;  %v1393_v30 = vadd.f32 %v1392_v27, %v1301_v24 }
 0x11f   : > { %v1482_v33 = vadd.f32 %v9187_v28, %v1399_v29 }
 0x120   : > { %v1474_v31 = vpop.f32.mrf.mxu0 }
 0x121   : > { %v1475_v35 = vadd.f32 %v1474_v31, %v1393_v30 }
 0x123   : > { %v9194_v32 = vpop.f32.mrf.mxu1 }
 0x124   : > { %v1565_v36 = vadd.f32 %v9194_v32, %v1482_v33 }
 0x125   : > { %v1556_v34 = vpop.f32.mrf.mxu1 }
 0x126   : > { %v9201_v37 = vpop.f32.mrf.mxu0  ;;  %v1557_v0 = vadd.f32 %v1556_v34, %v1475_v35 }
 0x127   : > { %v1648_v41 = vadd.f32 %v9201_v37, %v1565_v36 }
 0x128   : > { %v1641_v40 = vpop.f32.mrf.mxu0 }
 0x129   : > { %v1642_v43 = vadd.f32 %v1641_v40, %v1557_v0 }
 0x12b   : > { %v9208_v42 = vpop.f32.mrf.mxu1 }
 0x12c   : > { %v10506_v44 = vadd.f32 %v9208_v42, %v1648_v41 }
 0x12d   : > { %v1720_v1 = vpop.f32.mrf.mxu1 }
 0x12e   : > { %v10508_v45 = vadd.f32 %v1720_v1, %v1642_v43  ;;  %v4316_v46 = vsel %vm4300_vm1, %v10506_v44, -inf  ;;  %v9215_v47 = vpop.f32.mrf.mxu0 }
 0x12f   : > { %4317 = vmax.xlane.f32.xlu1 %v4316_v46 }
 0x130   : > { %v4313_v48 = vsel %vm4300_vm1, %v10508_v45, -inf  ;;  %v1815_v49 = vpop.f32.mrf.mxu0 }
 0x131   : > { %4314 = vmax.xlane.f32.xlu0 %v4313_v48 }
 0x133   : > { %v9222_v50 = vpop.f32.mrf.mxu1 }
 0x134   : > { %v1913_v53 = vadd.f32 %v9222_v50, %v9215_v47 }
 0x135   : > { %v1906_v51 = vpop.f32.mrf.mxu1 }
 0x136   : > { %v9229_v52 = vpop.f32.mrf.mxu0  ;;  %v1907_v54 = vadd.f32 %v1906_v51, %v1815_v49 }
 0x137   : > { %v1996_v57 = vadd.f32 %v9229_v52, %v1913_v53 }
 0x138   : > { %v1988_v55 = vpop.f32.mrf.mxu0 }
 0x139   : > { %v1989_v61 = vadd.f32 %v1988_v55, %v1907_v54 }
 0x13b   : > { %v9236_v56 = vpop.f32.mrf.mxu1 }
 0x13c   : > { %v2079_v62 = vadd.f32 %v9236_v56, %v1996_v57 }
 0x13d   : > { %v2070_v59 = vpop.f32.mrf.mxu1 }
 0x13e   : > { %v9243_v63 = vpop.f32.mrf.mxu0  ;;  %v2071_v2 = vadd.f32 %v2070_v59, %v1989_v61 }
 0x13f   : > { %v2162_v4 = vadd.f32 %v9243_v63, %v2079_v62 }
 0x140   : > { %v2155_v3 = vpop.f32.mrf.mxu0 }
 0x141   : > { %v2156_v6 = vadd.f32 %v2155_v3, %v2071_v2 }
 0x143   : > { %v9250_v5 = vpop.f32.mrf.mxu1 }
 0x144   : > { %v10514_v7 = vadd.f32 %v9250_v5, %v2162_v4 }
 0x145   : > { %v2234_v8 = vpop.f32.mrf.mxu1 }
 0x146   : > { %v10516_v9 = vadd.f32 %v2234_v8, %v2156_v6  ;;  %v4322_v10 = vsel %vm4300_vm1, %v10514_v7, -inf  ;;  %v9257_v11 = vpop.f32.mrf.mxu0 }
 0x147   : > { %4323 = vmax.xlane.f32.xlu1 %v4322_v10 }
 0x148   : > { %v4319_v12 = vsel %vm4300_vm1, %v10516_v9, -inf  ;;  %v2329_v13 = vpop.f32.mrf.mxu0 }
 0x149   : > { %4320 = vmax.xlane.f32.xlu0 %v4319_v12 }
 0x14b   : > { %v9264_v14 = vpop.f32.mrf.mxu1 }
 0x14c   : > { %v2427_v17 = vadd.f32 %v9264_v14, %v9257_v11 }
 0x14d   : > { %v2420_v15 = vpop.f32.mrf.mxu1 }
 0x14e   : > { %v9271_v16 = vpop.f32.mrf.mxu0  ;;  %v2421_v18 = vadd.f32 %v2420_v15, %v2329_v13 }
 0x14f   : > { %v2510_v23 = vadd.f32 %v9271_v16, %v2427_v17 }
 0x150   : > { %v2502_v19 = vpop.f32.mrf.mxu0 }
 0x151   : > { %v2503_v25 = vadd.f32 %v2502_v19, %v2421_v18 }
 0x153   : > { %v9278_v21 = vpop.f32.mrf.mxu1 }
 0x154   : > { %v2593_v26 = vadd.f32 %v9278_v21, %v2510_v23 }
 0x155   : > { %v2584_v24 = vpop.f32.mrf.mxu1 }
 0x156   : > { %v9285_v27 = vpop.f32.mrf.mxu0  ;;  %v2585_v28 = vadd.f32 %v2584_v24, %v2503_v25 }
 0x157   : > { %v2676_v30 = vadd.f32 %v9285_v27, %v2593_v26 }
 0x158   : > { %v2669_v29 = vpop.f32.mrf.mxu0 }
 0x159   : > { %v2670_v32 = vadd.f32 %v2669_v29, %v2585_v28 }
 0x15b   : > { %v9292_v31 = vpop.f32.mrf.mxu1 }
 0x15c   : > { %v10522_v33 = vadd.f32 %v9292_v31, %v2676_v30 }
 0x15d   : > { %v2748_v34 = vpop.f32.mrf.mxu1 }
 0x15e   : > { %v10524_v35 = vadd.f32 %v2748_v34, %v2670_v32  ;;  %v4328_v36 = vsel %vm4300_vm1, %v10522_v33, -inf  ;;  %v9299_v37 = vpop.f32.mrf.mxu0 }
 0x15f   : > { %4329 = vmax.xlane.f32.xlu1 %v4328_v36 }
 0x160   : > { %v4325_v0 = vsel %vm4300_vm1, %v10524_v35, -inf  ;;  %v2843_v40 = vpop.f32.mrf.mxu0 }
 0x161   : > { %4326 = vmax.xlane.f32.xlu0 %v4325_v0 }
 0x163   : > { %v9306_v41 = vpop.f32.mrf.mxu1 }
 0x164   : > { %v2941_v1 = vadd.f32 %v9306_v41, %v9299_v37 }
 0x165   : > { %v2934_v42 = vpop.f32.mrf.mxu1 }
 0x166   : > { %v9313_v43 = vpop.f32.mrf.mxu0  ;;  %v2935_v46 = vadd.f32 %v2934_v42, %v2843_v40 }
 0x167   : > { %v3024_v49 = vadd.f32 %v9313_v43, %v2941_v1 }
 0x168   : > { %v3016_v47 = vpop.f32.mrf.mxu0 }
 0x169   : > { %v3017_v51 = vadd.f32 %v3016_v47, %v2935_v46 }
 0x16b   : > { %v9320_v48 = vpop.f32.mrf.mxu1 }
 0x16c   : > { %v3107_v52 = vadd.f32 %v9320_v48, %v3024_v49 }
 0x16d   : > { %v3098_v50 = vpop.f32.mrf.mxu1 }
 0x16e   : > { %v9327_v53 = vpop.f32.mrf.mxu0  ;;  %v3099_v54 = vadd.f32 %v3098_v50, %v3017_v51 }
 0x16f   : > { %v3190_v56 = vadd.f32 %v9327_v53, %v3107_v52 }
 0x170   : > { %v3183_v55 = vpop.f32.mrf.mxu0 }
 0x171   : > { %v3184_v59 = vadd.f32 %v3183_v55, %v3099_v54 }
 0x173   : > { %v9334_v57 = vpop.f32.mrf.mxu1 }
 0x174   : > { %v10530_v61 = vadd.f32 %v9334_v57, %v3190_v56 }
 0x175   : > { %v3262_v62 = vpop.f32.mrf.mxu1 }
 0x176   : > { %v10532_v63 = vadd.f32 %v3262_v62, %v3184_v59  ;;  %v4334_v2 = vsel %vm4300_vm1, %v10530_v61, -inf  ;;  %v9341_v3 = vpop.f32.mrf.mxu0 }
 0x177   : > { %4335 = vmax.xlane.f32.xlu1 %v4334_v2 }
 0x178   : > { %v4331_v4 = vsel %vm4300_vm1, %v10532_v63, -inf  ;;  %v3357_v5 = vpop.f32.mrf.mxu0 }
 0x179   : > { %4332 = vmax.xlane.f32.xlu0 %v4331_v4 }
 0x17b   : > { %v9348_v6 = vpop.f32.mrf.mxu1 }
 0x17c   : > { %v3455_v11 = vadd.f32 %v9348_v6, %v9341_v3 }
 0x17d   : > { %v3448_v8 = vpop.f32.mrf.mxu1 }
 0x17e   : > { %v9355_v10 = vpop.f32.mrf.mxu0  ;;  %v3449_v12 = vadd.f32 %v3448_v8, %v3357_v5 }
 0x17f   : > { %v3538_v15 = vadd.f32 %v9355_v10, %v3455_v11 }
 0x180   : > { %v3530_v13 = vpop.f32.mrf.mxu0 }
 0x181   : > { %v3531_v17 = vadd.f32 %v3530_v13, %v3449_v12 }
 0x183   : > { %v9362_v14 = vpop.f32.mrf.mxu1 }
 0x184   : > { %v3621_v18 = vadd.f32 %v9362_v14, %v3538_v15 }
 0x185   : > { %v3612_v16 = vpop.f32.mrf.mxu1 }
 0x186   : > { %v9369_v19 = vpop.f32.mrf.mxu0  ;;  %v3613_v21 = vadd.f32 %v3612_v16, %v3531_v17 }
 0x187   : > { %v3704_v24 = vadd.f32 %v9369_v19, %v3621_v18 }
 0x188   : > { %v3697_v23 = vpop.f32.mrf.mxu0 }
 0x189   : > { %v3698_v27 = vadd.f32 %v3697_v23, %v3613_v21 }
 0x18a   : > { %v4303_v25 = vpop.xlane.xlu0 %4302 }
 0x18b   : > { %v9376_v26 = vpop.f32.mrf.mxu1  ;;  %v4349_v41 = vsub.f32 %v10490_v58, %v4303_v25 }
 0x18c   : > { %v10538_v28 = vadd.f32 %v9376_v26, %v3704_v24 }
 0x18d   : > { %v3776_v29 = vpop.f32.mrf.mxu1  ;;  %v4365_v46 = vmul.f32 1.442695, %v4349_v41 }
 0x18e   : > { %v10540_v30 = vadd.f32 %v3776_v29, %v3698_v27  ;;  %v4340_v31 = vsel %vm4300_vm1, %v10538_v28, -inf  ;;  %v4306_v32 = vpop.xlane.xlu0 %4305  ;;  %v9383_v34 = vpop.f32.mrf.mxu0  ;;  %v9860_v29 = vld [vmem:[%s10014_s25 + $0x8] sm:$0xff] }
 0x18f   : > { %4341 = vmax.xlane.f32.xlu1 %v4340_v31  ;;  %v4350_v37 = vsub.f32 %v10492_v60, %v4306_v32  ;;  %v10578_v31 = vsub.f32 %v9860_v29, %v10475_v38 }
 0x190   : > { %v4337_v36 = vsel %vm4300_vm1, %v10540_v30, -inf  ;;  %v3871_v0 = vpop.f32.mrf.mxu0 }
 0x191   : > { %4338 = vmax.xlane.f32.xlu0 %v4337_v36  ;;  %v4367_v42 = vmul.f32 1.442695, %v4350_v37  ;;  %v10581_v32 = vand.u32 4294901760, %v10578_v31  ;;  %9433 = vmatprep.subr.mxu0 %v10578_v31 }
 0x193   : > { %v9390_v40 = vpop.f32.mrf.mxu1  ;;  %9796 = vpow2.f32 %v4367_v42  ;;  %v4618_v36 = vsub.f32 %v10578_v31, %v10581_v32 }
 0x194   : > { %v3969_v47 = vadd.f32 %v9390_v40, %v9383_v34  ;;  %9798 = vpow2.f32 %v4365_v46  ;;  %v9861_v34 = vld [vmem:[%s10014_s25] sm:$0xff] }
 0x195   : > { %v3962_v43 = vpop.f32.mrf.mxu1  ;;  %v4619_v37 = vand.u32 4294901760, %v4618_v36 }
 0x196   : > { %v9397_v1 = vpop.f32.mrf.mxu0  ;;  %v3963_v48 = vadd.f32 %v3962_v43, %v3871_v0 }
 0x197   : > { %v4052_v51 = vadd.f32 %v9397_v1, %v3969_v47  ;;  %9426 = vmatprep.subr.mxu1 %v4619_v37 }
 0x198   : > { %v4044_v49 = vpop.f32.mrf.mxu0  ;;  %9427 = vmatpush3.msra.mxu1 %v4619_v37 }
 0x199   : > { %v4045_v53 = vadd.f32 %v4044_v49, %v3963_v48 }
 0x19b   : > { %v9404_v50 = vpop.f32.mrf.mxu1 }
 0x19c   : > { %v4135_v54 = vadd.f32 %v9404_v50, %v4052_v51 }
 0x19d   : > { %v4126_v52 = vpop.f32.mrf.mxu1 }
 0x19e   : > { %v9411_v55 = vpop.f32.mrf.mxu0  ;;  %v4127_v60 = vadd.f32 %v4126_v52, %v4045_v53 }
 0x19f   : > { %v4218_v57 = vadd.f32 %v9411_v55, %v4135_v54 }
 0x1a0   : > { %v4211_v56 = vpop.f32.mrf.mxu0  ;;  %v10555_v11 = vpop.eup %9796 }
 0x1a1   : > { %v4212_v2 = vadd.f32 %v4211_v56, %v4127_v60  ;;  %v10560_v13 = vpop.eup %9798  ;;  %v4400_v15 = vsel %vm4300_vm1, %v10555_v11, 0.0 }
 0x1a2   : > { %v4309_v59 = vpop.xlane.xlu1 %4308  ;;  %v4397_v16 = vsel %vm4300_vm1, %v10560_v13, 0.0 }
 0x1a3   : > { %v4351_v58 = vsub.f32 %v10498_v20, %v4309_v59  ;;  %v9418_v62 = vpop.f32.mrf.mxu1 }
 0x1a4   : > { %v10549_v3 = vadd.f32 %v9418_v62, %v4218_v57 }
 0x1a5   : > { %v4369_v4 = vmul.f32 1.442695, %v4351_v58  ;;  %v4290_v5 = vpop.f32.mrf.mxu1 }
 0x1a6   : > { %v10551_v6 = vadd.f32 %v4290_v5, %v4212_v2  ;;  %v4312_v8 = vpop.xlane.xlu1 %4311  ;;  %v4346_v10 = vsel %vm4300_vm1, %v10549_v3, -inf }
 0x1a7   : > { %9800 = vpow2.f32 %v4369_v4  ;;  %v4352_v12 = vsub.f32 %v10500_v22, %v4312_v8  ;;  %4347 = vmax.xlane.f32.xlu1 %v4346_v10 }
 0x1a8   : > { %v4343_v20 = vsel %vm4300_vm1, %v10551_v6, -inf }
 0x1a9   : > { %v4371_v14 = vmul.f32 1.442695, %v4352_v12  ;;  %4344 = vmax.xlane.f32.xlu0 %v4343_v20 }
 0x1ab   : > { %9802 = vpow2.f32 %v4371_v14  ;;  %4401 = vadd.xlane.f32.xlu1 %v4400_v15 }
 0x1ad   : > { %4398 = vadd.xlane.f32.xlu0 %v4397_v16 }
 0x1b4   : > { %v10566_v17 = vpop.eup %9800 }
 0x1b5   : > { %v4403_v22 = vsel %vm4300_vm1, %v10566_v17, 0.0 }
 0x1b6   : > { %4404 = vadd.xlane.f32.xlu0 %v4403_v22 }
 0x1b8   : > { %v10570_v18 = vpop.eup %9802  ;;  %v4318_v19 = vpop.xlane.xlu1 %4317 }
 0x1b9   : > { %v4354_v21 = vsub.f32 %v10506_v44, %v4318_v19  ;;  %v4406_v23 = vsel %vm4300_vm1, %v10570_v18, 0.0  ;;  %v10585_v44 = vsub.f32 %v9861_v34, %v10482_v39 }
 0x1ba   : > { %4407 = vadd.xlane.f32.xlu1 %v4406_v23  ;;  %v4315_v24 = vpop.xlane.xlu0 %4314 }
 0x1bb   : > { %v4375_v25 = vmul.f32 1.442695, %v4354_v21  ;;  %v4353_v26 = vsub.f32 %v10508_v45, %v4315_v24  ;;  %v10591_v45 = vand.u32 4294901760, %v10585_v44 }
 0x1bd   : > { %9804 = vpow2.f32 %v4375_v25  ;;  %v4373_v27 = vmul.f32 1.442695, %v4353_v26  ;;  %v4625_v0 = vsub.f32 %v10585_v44, %v10591_v45 }
 0x1bf   : > { %9806 = vpow2.f32 %v4373_v27  ;;  %v4626_v40 = vand.u32 4294901760, %v4625_v0 }
 0x1c1   : > { %9428 = vmatprep.subr.mxu1 %v4626_v40 }
 0x1c2   : > { %9429 = vmatpush3.msra.mxu1 %v4626_v40 }
 0x1c3   : > { %9440 = vmatprep.subr.mxu1 %v10475_v38 }
 0x1ca   : > { %v10595_v41 = vpop.eup %9804 }
 0x1cb   : > { %v4412_v42 = vsel %vm4300_vm1, %v10595_v41, 0.0 }
 0x1cc   : > { %v10599_v43 = vpop.eup %9806  ;;  %4413 = vadd.xlane.f32.xlu1 %v4412_v42 }
 0x1cd   : > { %v4409_v1 = vsel %vm4300_vm1, %v10599_v43, 0.0 }
 0x1ce   : > { %4410 = vadd.xlane.f32.xlu0 %v4409_v1  ;;  %v9862_v1 = vld [vmem:[%s10014_s25 + $0x18] sm:$0xff] }
 0x1d0   : > { %v4324_v46 = vpop.xlane.xlu1 %4323 }
 0x1d1   : > { %v4356_v47 = vsub.f32 %v10514_v7, %v4324_v46  ;;  %v10650_v46 = vand.u32 4294901760, %v9862_v1 }
 0x1d2   : > { %v4321_v48 = vpop.xlane.xlu0 %4320 }
 0x1d3   : > { %v4379_v49 = vmul.f32 1.442695, %v4356_v47  ;;  %v4355_v50 = vsub.f32 %v10516_v9, %v4321_v48 }
 0x1d5   : > { %9808 = vpow2.f32 %v4379_v49  ;;  %v4377_v51 = vmul.f32 1.442695, %v4355_v50  ;;  %v9863_v50 = vld [vmem:[%s10014_s25 + $0x10] sm:$0xff] }
 0x1d7   : > { %9810 = vpow2.f32 %v4377_v51  ;;  %v10659_v51 = vand.u32 4294901760, %v9863_v50 }
 0x1e2   : > { %v10606_v52 = vpop.eup %9808 }
 0x1e3   : > { %v4418_v53 = vsel %vm4300_vm1, %v10606_v52, 0.0 }
 0x1e4   : > { %v10610_v54 = vpop.eup %9810  ;;  %4419 = vadd.xlane.f32.xlu1 %v4418_v53 }
 0x1e5   : > { %v4415_v55 = vsel %vm4300_vm1, %v10610_v54, 0.0 }
 0x1e6   : > { %4416 = vadd.xlane.f32.xlu0 %v4415_v55 }
 0x1e8   : > { %v4330_v7 = vpop.xlane.xlu1 %4329 }
 0x1e9   : > { %v4358_v60 = vsub.f32 %v10522_v33, %v4330_v7 }
 0x1ea   : > { %v4327_v56 = vpop.xlane.xlu0 %4326 }
 0x1eb   : > { %v4383_v9 = vmul.f32 1.442695, %v4358_v60  ;;  %v4357_v57 = vsub.f32 %v10524_v35, %v4327_v56  ;;  %v10665_v60 = vsub.f32 %v9862_v1, %v10650_v46 }
 0x1ed   : > { %9812 = vpow2.f32 %v4383_v9  ;;  %v4381_v59 = vmul.f32 1.442695, %v4357_v57 }
 0x1ef   : > { %9814 = vpow2.f32 %v4381_v59  ;;  %v10679_v59 = vsub.f32 %v9863_v50, %v10659_v51 }
 0x1fa   : > { %v10616_v58 = vpop.eup %9812 }
 0x1fb   : > { %v4424_v62 = vsel %vm4300_vm1, %v10616_v58, 0.0 }
 0x1fc   : > { %v10620_v2 = vpop.eup %9814  ;;  %4425 = vadd.xlane.f32.xlu1 %v4424_v62 }
 0x1fd   : > { %v4421_v4 = vsel %vm4300_vm1, %v10620_v2, 0.0 }
 0x1fe   : > { %4422 = vadd.xlane.f32.xlu0 %v4421_v4  ;;  %v10685_v4 = vand.u32 4294901760, %v10665_v60 }
 0x200   : > { %v4336_v33 = vpop.xlane.xlu1 %4335 }
 0x201   : > { %v4360_v5 = vsub.f32 %v10530_v61, %v4336_v33 }
 0x202   : > { %v4333_v8 = vpop.xlane.xlu0 %4332 }
 0x203   : > { %v4387_v35 = vmul.f32 1.442695, %v4360_v5  ;;  %v4359_v10 = vsub.f32 %v10532_v63, %v4333_v8  ;;  %v10691_v8 = vand.u32 4294901760, %v10679_v59 }
 0x205   : > { %9816 = vpow2.f32 %v4387_v35  ;;  %v4385_v12 = vmul.f32 1.442695, %v4359_v10 }
 0x207   : > { %9818 = vpow2.f32 %v4385_v12  ;;  %v5126_v12 = vsub.f32 %v10665_v60, %v10685_v4 }
 0x212   : > { %v10626_v20 = vpop.eup %9816 }
 0x213   : > { %v4430_v14 = vsel %vm4300_vm1, %v10626_v20, 0.0 }
 0x214   : > { %v10630_v15 = vpop.eup %9818  ;;  %4431 = vadd.xlane.f32.xlu1 %v4430_v14 }
 0x215   : > { %v4427_v16 = vsel %vm4300_vm1, %v10630_v15, 0.0 }
 0x216   : > { %4428 = vadd.xlane.f32.xlu0 %v4427_v16 }
 0x218   : > { %v4342_v61 = vpop.xlane.xlu1 %4341 }
 0x219   : > { %v4362_v22 = vsub.f32 %v10538_v28, %v4342_v61 }
 0x21a   : > { %v4339_v19 = vpop.xlane.xlu0 %4338 }
 0x21b   : > { %v4391_v63 = vmul.f32 1.442695, %v4362_v22  ;;  %v4361_v21 = vsub.f32 %v10540_v30, %v4339_v19  ;;  %v5133_v19 = vsub.f32 %v10679_v59, %v10691_v8 }
 0x21d   : > { %9820 = vpow2.f32 %v4391_v63  ;;  %v4389_v23 = vmul.f32 1.442695, %v4361_v21  ;;  %v5127_v21 = vand.u32 4294901760, %v5126_v12 }
 0x21f   : > { %9822 = vpow2.f32 %v4389_v23 }
 0x22a   : > { %v10636_v24 = vpop.eup %9820 }
 0x22b   : > { %v4436_v25 = vsel %vm4300_vm1, %v10636_v24, 0.0 }
 0x22c   : > { %v10640_v26 = vpop.eup %9822  ;;  %4437 = vadd.xlane.f32.xlu1 %v4436_v25 }
 0x22d   : > { %v4433_v27 = vsel %vm4300_vm1, %v10640_v26, 0.0 }
 0x22e   : > { %4434 = vadd.xlane.f32.xlu0 %v4433_v27 }
 0x230   : > { %v4348_v28 = vpop.xlane.xlu1 %4347 }
 0x231   : > { %v4364_v30 = vsub.f32 %v10549_v3, %v4348_v28 }
 0x232   : > { %v4345_v29 = vpop.xlane.xlu0 %4344 }
 0x233   : > { %v4395_v34 = vmul.f32 1.442695, %v4364_v30  ;;  %v4363_v36 = vsub.f32 %v10551_v6, %v4345_v29  ;;  %v9864_v30 = vld [vmem:[%s10014_s25 + $0x28] sm:$0xff]  ;;  %v5134_v29 = vand.u32 4294901760, %v5133_v19 }
 0x234   : > { %v4402_v37 = vpop.xlane.xlu1 %4401 }
 0x235   : > { %9824 = vpow2.f32 %v4395_v34  ;;  %v4393_v0 = vmul.f32 1.442695, %v4363_v36 }
 0x236   : > { %9826 = vrcp.f32 %v4402_v37  ;;  %v4399_v40 = vpop.xlane.xlu0 %4398 }
 0x237   : > { %9828 = vpow2.f32 %v4393_v0 }
 0x238   : > { %9830 = vrcp.f32 %v4399_v40  ;;  %v9865_v40 = vld [vmem:[%s10014_s25 + $0x20] sm:$0xff] }
 0x23f   : > { %v4405_v42 = vpop.xlane.xlu0 %4404 }
 0x240   : > { %9832 = vrcp.f32 %v4405_v42  ;;  %v10732_v42 = vand.u32 4294901760, %v9865_v40 }
 0x242   : > { %v10652_v3 = vpop.eup %9824 }
 0x243   : > { %v9827_v47 = vpop.eup %9826  ;;  %v4408_v6 = vpop.xlane.xlu1 %4407  ;;  %v4442_v48 = vsel %vm4300_vm1, %v10652_v3, 0.0 }
 0x244   : > { %v10656_v49 = vpop.eup %9828  ;;  %9834 = vrcp.f32 %v4408_v6  ;;  %4443 = vadd.xlane.f32.xlu1 %v4442_v48  ;;  %v4448_v53 = vmul.f32 %v9827_v47, %v10555_v11  ;;  %v10750_v6 = vsub.f32 %v9865_v40, %v10732_v42 }
 0x245   : > { %v9831_v55 = vpop.eup %9830  ;;  %v4439_v7 = vsel %vm4300_vm1, %v10656_v49, 0.0 }
 0x246   : > { %4440 = vadd.xlane.f32.xlu0 %v4439_v7  ;;  %v4446_v56 = vmul.f32 %v9831_v55, %v10560_v13  ;;  %4478 = vst.msk [vmem:[%s10668_s28 + $0x8] sm:$0xff] %vm4300_vm1, %v4448_v53  ;;  %v4497_v9 = vsel %vm4300_vm1, %v4448_v53, 0  ;;  %v10762_v53 = vand.u32 4294901760, %v10750_v6 }
 0x247   : > { %v10673_v57 = vand.u32 4294901760, %v4497_v9 }
 0x248   : > { %4477 = vst.msk [vmem:[%s10668_s28] sm:$0xff] %vm4300_vm1, %v4446_v56  ;;  %v4494_v11 = vsel %vm4300_vm1, %v4446_v56, 0  ;;  %v5641_v56 = vsub.f32 %v10750_v6, %v10762_v53 }
 0x249   : > { %v10681_v62 = vand.u32 4294901760, %v4494_v11  ;;  %v4577_v13 = vsub.f32 %v4497_v9, %v10673_v57 }
 0x24b   : > { %9430 = vmatprep.mubr.f32.mxu1 %v10681_v62  ;;  %v4567_v33 = vsub.f32 %v4494_v11, %v10681_v62  ;;  %v4578_v5 = vand.u32 4294901760, %v4577_v13 }
 0x24c   : > { %9431 = vmatmul.mubr.f32.vlgmr.msra.gmra.mxu1 %v10673_v57 }
 0x24d   : > { %v9833_v35 = vpop.eup %9832  ;;  %9441 = vmatpush3.msra.mxu1 %v10475_v38  ;;  %v4568_v10 = vand.u32 4294901760, %v4567_v33  ;;  %v4579_v14 = vsub.f32 %v4577_v13, %v4578_v5 }
 0x24e   : > { %9442 = vmatprep.subr.mxu1 %v10482_v39  ;;  %v4450_v16 = vmul.f32 %v9833_v35, %v10566_v17 }
 0x24f   : > { %9443 = vmatpush3.msra.mxu1 %v10482_v39  ;;  %9444 = vmatprep.mubr.f32.mxu1 %v4568_v10  ;;  %v4569_v61 = vsub.f32 %v4567_v33, %v4568_v10  ;;  %v4580_v25 = vand.u32 4294901760, %v4579_v14 }
 0x250   : > { %9445 = vmatmul.mubr.f32.vlgmr.msra.gmra.mxu1 %v4578_v5  ;;  %9454 = vmatprep.subr.mxu1 %v10475_v38  ;;  %4479 = vst.msk [vmem:[%s10668_s28 + $0x10] sm:$0xff] %vm4300_vm1, %v4450_v16  ;;  %v5002_v22 = vsel %vm4300_vm1, %v4450_v16, 0 }
 0x251   : > { %v9835_v63 = vpop.eup %9834  ;;  %9455 = vmatpush3.msra.mxu1 %v10475_v38  ;;  %9458 = vmatprep.mubr.f32.mxu1 %v10681_v62  ;;  %v4570_v17 = vand.u32 4294901760, %v4569_v61  ;;  %v10707_v23 = vand.u32 4294901760, %v5002_v22  ;;  %v10716_v38 = vand.u32 4294901760, %v9864_v30 }
 0x252   : > { %9456 = vmatprep.subr.mxu1 %v10482_v39  ;;  %v4452_v27 = vmul.f32 %v9835_v63, %v10570_v18 }
 0x253   : > { %9423 = vmatprep.mubr.f32.mxu0 %v4570_v17  ;;  %9457 = vmatpush3.msra.mxu1 %v10482_v39  ;;  %v10713_v28 = vsub.f32 %v5002_v22, %v10707_v23 }
 0x254   : > { %9424 = vmatmul.mubr.f32.vlgmr.msra.gmra.mxu0 %v4580_v25  ;;  %9459 = vmatmul.mubr.f32.vlgmr.msra.gmra.mxu1 %v10673_v57  ;;  %4480 = vst.msk [vmem:[%s10668_s28 + $0x18] sm:$0xff] %vm4300_vm1, %v4452_v27  ;;  %v5005_v34 = vsel %vm4300_vm1, %v4452_v27, 0 }
 0x255   : > { %9468 = vmatprep.subr.mxu1 %v5127_v21  ;;  %9434 = vmatpush3.msra.mxu0 %v10578_v31  ;;  %v4414_v18 = vpop.xlane.xlu1 %4413  ;;  %v10723_v39 = vand.u32 4294901760, %v5005_v34  ;;  %v5076_v36 = vand.u32 4294901760, %v10713_v28  ;;  %v10736_v31 = vsub.f32 %v9864_v30, %v10716_v38 }
 0x256   : > { %9437 = vmatprep.mubr.f32.mxu0 %v4567_v33  ;;  %9469 = vmatpush3.msra.mxu1 %v5127_v21  ;;  %9836 = vrcp.f32 %v4414_v18 }
 0x257   : > { %9472 = vmatprep.mubr.f32.mxu1 %v10707_v23  ;;  %9435 = vmatprep.subr.mxu0 %v10585_v44  ;;  %v10729_v37 = vsub.f32 %v5005_v34, %v10723_v39  ;;  %v4411_v0 = vpop.xlane.xlu0 %4410  ;;  %v5077_v47 = vsub.f32 %v10713_v28, %v5076_v36 }
 0x258   : > { %9470 = vmatprep.subr.mxu1 %v5134_v29  ;;  %9436 = vmatpush3.msra.mxu0 %v10585_v44  ;;  %9838 = vrcp.f32 %v4411_v0  ;;  %v10747_v44 = vand.u32 4294901760, %v10736_v31 }
 0x259   : > { %9471 = vmatpush3.msra.mxu1 %v5134_v29  ;;  %9438 = vmatmul.mubr.f32.vlgmr.msra.gmra.mxu0 %v4577_v13  ;;  %v5086_v1 = vand.u32 4294901760, %v10729_v37 }
 0x25a   : > { %9447 = vmatprep.subr.mxu0 %v10581_v32  ;;  %9473 = vmatmul.mubr.f32.vlgmr.msra.gmra.mxu1 %v10723_v39  ;;  %v5634_v50 = vsub.f32 %v10736_v31, %v10747_v44 }
 0x25b   : > { %9482 = vmatprep.subr.mxu1 %v10650_v46  ;;  %9448 = vmatpush3.msra.mxu0 %v10581_v32  ;;  %v5087_v48 = vsub.f32 %v10729_v37, %v5086_v1  ;;  %v5078_v32 = vand.u32 4294901760, %v5077_v47 }
 0x25c   : > { %9451 = vmatprep.mubr.f32.mxu0 %v10681_v62  ;;  %9483 = vmatpush3.msra.mxu1 %v10650_v46  ;;  %v5635_v7 = vand.u32 4294901760, %v5634_v50 }
 0x25d   : > { %9486 = vmatprep.mubr.f32.mxu1 %v5076_v36  ;;  %9449 = vmatprep.subr.mxu0 %v10591_v45 }
 0x25e   : > { %9484 = vmatprep.subr.mxu1 %v10659_v51  ;;  %9450 = vmatpush3.msra.mxu0 %v10591_v45  ;;  %v5088_v45 = vand.u32 4294901760, %v5087_v48 }
 0x25f   : > { %9485 = vmatpush3.msra.mxu1 %v10659_v51  ;;  %9452 = vmatmul.mubr.f32.vlgmr.msra.gmra.mxu0 %v10673_v57 }
 0x260   : > { %9461 = vmatprep.subr.mxu0 %v10650_v46  ;;  %9487 = vmatmul.mubr.f32.vlgmr.msra.gmra.mxu1 %v5086_v1 }
 0x261   : > { %9496 = vmatprep.subr.mxu1 %v10650_v46  ;;  %9462 = vmatpush3.msra.mxu0 %v10650_v46 }
 0x262   : > { %9465 = vmatprep.mubr.f32.mxu0 %v5078_v32  ;;  %9497 = vmatpush3.msra.mxu1 %v10650_v46  ;;  %v9866_v46 = vld [vmem:[%s10014_s25 + $0x38] sm:$0xff] }
 0x263   : > { %v9837_v55 = vpop.eup %9836  ;;  %9500 = vmatprep.mubr.f32.mxu1 %v10707_v23  ;;  %9463 = vmatprep.subr.mxu0 %v10659_v51  ;;  %v10776_v11 = vand.u32 4294901760, %v9866_v46 }
 0x264   : > { %9498 = vmatprep.subr.mxu1 %v10659_v51  ;;  %9464 = vmatpush3.msra.mxu0 %v10659_v51  ;;  %v4456_v9 = vmul.f32 %v9837_v55, %v10595_v41 }
 0x265   : > { %v9839_v57 = vpop.eup %9838  ;;  %9499 = vmatpush3.msra.mxu1 %v10659_v51  ;;  %9466 = vmatmul.mubr.f32.vlgmr.msra.gmra.mxu0 %v5088_v45  ;;  %v5642_v51 = vand.u32 4294901760, %v5641_v56  ;;  %v10802_v10 = vsub.f32 %v9866_v46, %v10776_v11 }
 0x266   : > { %9475 = vmatprep.subr.mxu0 %v10665_v60  ;;  %9501 = vmatmul.mubr.f32.vlgmr.msra.gmra.mxu1 %v10723_v39  ;;  %v4454_v62 = vmul.f32 %v9839_v57, %v10599_v43  ;;  %4482 = vst.msk [vmem:[%s10668_s28 + $0x28] sm:$0xff] %vm4300_vm1, %v4456_v9  ;;  %v5513_v13 = vsel %vm4300_vm1, %v4456_v9, 0 }
 0x267   : > { %9476 = vmatpush3.msra.mxu0 %v10665_v60  ;;  %9479 = vmatprep.mubr.f32.mxu0 %v10713_v28  ;;  %v10786_v41 = vand.u32 4294901760, %v5513_v13  ;;  %v9867_v60 = vld [vmem:[%s10014_s25 + $0x30] sm:$0xff]  ;;  %v9868_v28 = vld [vmem:[%s10014_s25 + $0x48] sm:$0xff] }
 0x268   : > { %9477 = vmatprep.subr.mxu0 %v10679_v59  ;;  %9510 = vmatprep.subr.mxu1 %v5635_v7  ;;  %4481 = vst.msk [vmem:[%s10668_s28 + $0x20] sm:$0xff] %vm4300_vm1, %v4454_v62  ;;  %v5510_v33 = vsel %vm4300_vm1, %v4454_v62, 0  ;;  %v10797_v35 = vand.u32 4294901760, %v9867_v60  ;;  %v10842_v30 = vand.u32 4294901760, %v9868_v28  ;;  %v9870_v62 = vld [vmem:[%s10014_s25 + $0x58] sm:$0xff] }
 0x269   : > { %9478 = vmatpush3.msra.mxu0 %v10679_v59  ;;  %9511 = vmatpush3.msra.mxu1 %v5635_v7  ;;  %v10793_v43 = vand.u32 4294901760, %v5510_v33  ;;  %v5593_v5 = vsub.f32 %v5513_v13, %v10786_v41  ;;  %v10898_v13 = vand.u32 4294901760, %v9870_v62 }
 0x26a   : > { %9480 = vmatmul.mubr.f32.vlgmr.msra.gmra.mxu0 %v10729_v37  ;;  %9489 = vmatprep.subr.mxu0 %v10685_v4  ;;  %v10815_v61 = vsub.f32 %v9867_v60, %v10797_v35 }
 0x26b   : > { %9490 = vmatpush3.msra.mxu0 %v10685_v4  ;;  %9493 = vmatprep.mubr.f32.mxu0 %v10707_v23  ;;  %v5583_v59 = vsub.f32 %v5510_v33, %v10793_v43  ;;  %v5594_v16 = vand.u32 4294901760, %v5593_v5  ;;  %v10812_v4 = vand.u32 4294901760, %v10802_v10 }
 0x26c   : > { %9491 = vmatprep.subr.mxu0 %v10691_v8  ;;  %9512 = vmatprep.subr.mxu1 %v5642_v51  ;;  %v10827_v21 = vand.u32 4294901760, %v10815_v61 }
 0x26d   : > { %9492 = vmatpush3.msra.mxu0 %v10691_v8  ;;  %9513 = vmatpush3.msra.mxu1 %v5642_v51  ;;  %v4420_v12 = vpop.xlane.xlu1 %4419  ;;  %v5584_v14 = vand.u32 4294901760, %v5583_v59  ;;  %v5595_v19 = vsub.f32 %v5593_v5, %v5594_v16  ;;  %v6142_v17 = vsub.f32 %v10802_v10, %v10812_v4 }
 0x26e   : > { %9494 = vmatmul.mubr.f32.vlgmr.msra.gmra.mxu0 %v10723_v39  ;;  %9514 = vmatprep.mubr.f32.mxu1 %v10793_v43  ;;  %9840 = vrcp.f32 %v4420_v12  ;;  %v6149_v27 = vsub.f32 %v10815_v61, %v10827_v21  ;;  %v9869_v39 = vld [vmem:[%s10014_s25 + $0x40] sm:$0xff] }
 0x26f   : > { %9515 = vmatmul.mubr.f32.vlgmr.msra.gmra.mxu1 %v10786_v41  ;;  %9524 = vmatprep.subr.mxu1 %v10716_v38  ;;  %v4417_v8 = vpop.xlane.xlu0 %4416  ;;  %v5585_v22 = vsub.f32 %v5583_v59, %v5584_v14  ;;  %v5596_v23 = vand.u32 4294901760, %v5595_v19  ;;  %v6143_v25 = vand.u32 4294901760, %v6142_v17  ;;  %v10851_v36 = vand.u32 4294901760, %v9869_v39 }
 0x270   : > { %9525 = vmatpush3.msra.mxu1 %v10716_v38  ;;  %9528 = vmatprep.mubr.f32.mxu1 %v5584_v14  ;;  %9842 = vrcp.f32 %v4417_v8 }
 0x271   : > { %9526 = vmatprep.subr.mxu1 %v10732_v42  ;;  %9503 = vmatprep.subr.mxu0 %v10716_v38  ;;  %v5586_v63 = vand.u32 4294901760, %v5585_v22  ;;  %v10873_v47 = vsub.f32 %v9869_v39, %v10851_v36 }
 0x272   : > { %9527 = vmatpush3.msra.mxu1 %v10732_v42  ;;  %9504 = vmatpush3.msra.mxu0 %v10716_v38 }
 0x273   : > { %9529 = vmatmul.mubr.f32.vlgmr.msra.gmra.mxu1 %v5594_v16  ;;  %9538 = vmatprep.subr.mxu1 %v10716_v38  ;;  %v10883_v45 = vand.u32 4294901760, %v10873_v47 }
 0x274   : > { %9539 = vmatpush3.msra.mxu1 %v10716_v38  ;;  %9542 = vmatprep.mubr.f32.mxu1 %v10793_v43  ;;  %v6150_v38 = vand.u32 4294901760, %v6149_v27 }
 0x275   : > { %9505 = vmatprep.subr.mxu0 %v10732_v42  ;;  %9540 = vmatprep.subr.mxu1 %v10732_v42  ;;  %v6657_v46 = vsub.f32 %v10873_v47, %v10883_v45 }
 0x276   : > { %9506 = vmatpush3.msra.mxu0 %v10732_v42  ;;  %9507 = vmatprep.mubr.f32.mxu0 %v5586_v63 }
 0x277   : > { %9541 = vmatpush3.msra.mxu1 %v10732_v42  ;;  %9508 = vmatmul.mubr.f32.vlgmr.msra.gmra.mxu0 %v5596_v23 }
 0x278   : > { %9517 = vmatprep.subr.mxu0 %v10736_v31  ;;  %9543 = vmatmul.mubr.f32.vlgmr.msra.gmra.mxu1 %v10786_v41 }
 0x279   : > { %9518 = vmatpush3.msra.mxu0 %v10736_v31  ;;  %9521 = vmatprep.mubr.f32.mxu0 %v5583_v59 }
 0x27a   : > { %9519 = vmatprep.subr.mxu0 %v10750_v6  ;;  %9552 = vmatprep.subr.mxu1 %v6143_v25 }
 0x27b   : > { %v9841_v29 = vpop.eup %9840  ;;  %9520 = vmatpush3.msra.mxu0 %v10750_v6  ;;  %9553 = vmatpush3.msra.mxu1 %v6143_v25 }
 0x27c   : > { %9522 = vmatmul.mubr.f32.vlgmr.msra.gmra.mxu0 %v5593_v5  ;;  %9531 = vmatprep.subr.mxu0 %v10747_v44  ;;  %v4460_v34 = vmul.f32 %v9841_v29, %v10606_v52  ;;  %v10859_v52 = vsub.f32 %v9868_v28, %v10842_v30  ;;  %v9872_v29 = vld [vmem:[%s10014_s25 + $0x68] sm:$0xff] }
 0x27d   : > { %v9843_v18 = vpop.eup %9842  ;;  %9532 = vmatpush3.msra.mxu0 %v10747_v44  ;;  %9535 = vmatprep.mubr.f32.mxu0 %v10793_v43  ;;  %v9871_v43 = vld [vmem:[%s10014_s25 + $0x50] sm:$0xff] }
 0x27e   : > { %9533 = vmatprep.subr.mxu0 %v10762_v53  ;;  %9554 = vmatprep.subr.mxu1 %v6150_v38  ;;  %v4458_v37 = vmul.f32 %v9843_v18, %v10610_v54  ;;  %4484 = vst.msk [vmem:[%s10668_s28 + $0x38] sm:$0xff] %vm4300_vm1, %v4460_v34  ;;  %v6021_v0 = vsel %vm4300_vm1, %v4460_v34, 0  ;;  %v10870_v1 = vand.u32 4294901760, %v10859_v52  ;;  %v10906_v5 = vand.u32 4294901760, %v9871_v43 }
 0x27f   : > { %9534 = vmatpush3.msra.mxu0 %v10762_v53  ;;  %9555 = vmatpush3.msra.mxu1 %v6150_v38  ;;  %v6100_v40 = vand.u32 4294901760, %v6021_v0  ;;  %v10948_v34 = vand.u32 4294901760, %v9872_v29 }
 0x280   : > { %9536 = vmatmul.mubr.f32.vlgmr.msra.gmra.mxu0 %v10786_v41  ;;  %4483 = vst.msk [vmem:[%s10668_s28 + $0x30] sm:$0xff] %vm4300_vm1, %v4458_v37  ;;  %v6018_v42 = vsel %vm4300_vm1, %v4458_v37, 0  ;;  %9566 = vmatprep.subr.mxu1 %v10776_v11  ;;  %v6650_v53 = vsub.f32 %v10859_v52, %v10870_v1  ;;  %v10926_v16 = vsub.f32 %v9871_v43, %v10906_v5  ;;  %v9873_v37 = vld [vmem:[%s10014_s25 + $0x60] sm:$0xff]  ;;  %v9875_v43 = vld [vmem:[%s10014_s25 + $0x70] sm:$0xff] }
 0x281   : > { %v6090_v54 = vand.u32 4294901760, %v6018_v42  ;;  %v6101_v31 = vsub.f32 %v6021_v0, %v6100_v40  ;;  %9545 = vmatprep.subr.mxu0 %v10776_v11  ;;  %v10956_v0 = vand.u32 4294901760, %v9873_v37 }
 0x282   : > { %9546 = vmatpush3.msra.mxu0 %v10776_v11  ;;  %v6651_v57 = vand.u32 4294901760, %v6650_v53  ;;  %v10933_v17 = vand.u32 4294901760, %v10926_v16 }
 0x283   : > { %9556 = vmatprep.mubr.f32.mxu1 %v6090_v54  ;;  %v6091_v44 = vsub.f32 %v6018_v42, %v6090_v54  ;;  %v6102_v6 = vand.u32 4294901760, %v6101_v31  ;;  %9547 = vmatprep.subr.mxu0 %v10797_v35  ;;  %v10964_v42 = vsub.f32 %v9872_v29, %v10948_v34 }
 0x284   : > { %9557 = vmatmul.mubr.f32.vlgmr.msra.gmra.mxu1 %v6100_v40  ;;  %9548 = vmatpush3.msra.mxu0 %v10797_v35  ;;  %v7165_v38 = vsub.f32 %v10926_v16, %v10933_v17 }
 0x285   : > { %v4426_v48 = vpop.xlane.xlu1 %4425  ;;  %9567 = vmatpush3.msra.mxu1 %v10776_v11  ;;  %v6092_v32 = vand.u32 4294901760, %v6091_v44  ;;  %9559 = vmatprep.subr.mxu0 %v10802_v10  ;;  %v6103_v50 = vsub.f32 %v6101_v31, %v6102_v6 }
 0x286   : > { %9844 = vrcp.f32 %v4426_v48  ;;  %9568 = vmatprep.subr.mxu1 %v10797_v35 }
 0x287   : > { %9569 = vmatpush3.msra.mxu1 %v10797_v35  ;;  %9570 = vmatprep.mubr.f32.mxu1 %v6092_v32  ;;  %v4423_v55 = vpop.xlane.xlu0 %4422  ;;  %v6093_v7 = vsub.f32 %v6091_v44, %v6092_v32  ;;  %v6104_v9 = vand.u32 4294901760, %v6103_v50 }
 0x288   : > { %9846 = vrcp.f32 %v4423_v55  ;;  %9571 = vmatmul.mubr.f32.vlgmr.msra.gmra.mxu1 %v6102_v6  ;;  %9580 = vmatprep.subr.mxu1 %v10776_v11 }
 0x289   : > { %9581 = vmatpush3.msra.mxu1 %v10776_v11  ;;  %9584 = vmatprep.mubr.f32.mxu1 %v6090_v54  ;;  %v6094_v56 = vand.u32 4294901760, %v6093_v7  ;;  %v6658_v11 = vand.u32 4294901760, %v6657_v46 }
 0x28a   : > { %9582 = vmatprep.subr.mxu1 %v10797_v35 }
 0x28b   : > { %9549 = vmatprep.mubr.f32.mxu0 %v6094_v56  ;;  %9583 = vmatpush3.msra.mxu1 %v10797_v35 }
 0x28c   : > { %9550 = vmatmul.mubr.f32.vlgmr.msra.gmra.mxu0 %v6104_v9  ;;  %9585 = vmatmul.mubr.f32.vlgmr.msra.gmra.mxu1 %v6100_v40 }
 0x28d   : > { %9560 = vmatpush3.msra.mxu0 %v10802_v10  ;;  %9563 = vmatprep.mubr.f32.mxu0 %v6091_v44  ;;  %v10914_v10 = vsub.f32 %v9870_v62, %v10898_v13  ;;  %v9874_v62 = vld [vmem:[%s10014_s25 + $0x78] sm:$0xff] }
 0x28e   : > { %9561 = vmatprep.subr.mxu0 %v10815_v61  ;;  %9594 = vmatprep.subr.mxu1 %v6651_v57 }
 0x28f   : > { %9562 = vmatpush3.msra.mxu0 %v10815_v61  ;;  %9595 = vmatpush3.msra.mxu1 %v6651_v57  ;;  %v10923_v14 = vand.u32 4294901760, %v10914_v10 }
 0x290   : > { %9564 = vmatmul.mubr.f32.vlgmr.msra.gmra.mxu0 %v6101_v31  ;;  %9573 = vmatprep.subr.mxu0 %v10812_v4 }
 0x291   : > { %9574 = vmatpush3.msra.mxu0 %v10812_v4  ;;  %9577 = vmatprep.mubr.f32.mxu0 %v6090_v54  ;;  %v7158_v63 = vsub.f32 %v10914_v10, %v10923_v14 }
 0x292   : > { %9575 = vmatprep.subr.mxu0 %v10827_v21  ;;  %9596 = vmatprep.subr.mxu1 %v6658_v11 }
 0x293   : > { %v9845_v41 = vpop.eup %9844  ;;  %9576 = vmatpush3.msra.mxu0 %v10827_v21  ;;  %9597 = vmatpush3.msra.mxu1 %v6658_v11  ;;  %v7159_v28 = vand.u32 4294901760, %v7158_v63 }
 0x294   : > { %9578 = vmatmul.mubr.f32.vlgmr.msra.gmra.mxu0 %v6100_v40  ;;  %v4464_v51 = vmul.f32 %v9845_v41, %v10616_v58  ;;  %9608 = vmatprep.subr.mxu1 %v10842_v30 }
 0x295   : > { %v9847_v33 = vpop.eup %9846  ;;  %9587 = vmatprep.subr.mxu0 %v10842_v30 }
 0x296   : > { %v4462_v60 = vmul.f32 %v9847_v33, %v10620_v2  ;;  %4486 = vst.msk [vmem:[%s10668_s28 + $0x48] sm:$0xff] %vm4300_vm1, %v4464_v51  ;;  %v6529_v35 = vsel %vm4300_vm1, %v4464_v51, 0  ;;  %9588 = vmatpush3.msra.mxu0 %v10842_v30 }
 0x297   : > { %v6608_v58 = vand.u32 4294901760, %v6529_v35  ;;  %9589 = vmatprep.subr.mxu0 %v10851_v36 }
 0x298   : > { %4485 = vst.msk [vmem:[%s10668_s28 + $0x40] sm:$0xff] %vm4300_vm1, %v4462_v60  ;;  %v6526_v59 = vsel %vm4300_vm1, %v4462_v60, 0  ;;  %9590 = vmatpush3.msra.mxu0 %v10851_v36 }
 0x299   : > { %v6598_v12 = vand.u32 4294901760, %v6526_v59  ;;  %v6609_v2 = vsub.f32 %v6529_v35, %v6608_v58  ;;  %9601 = vmatprep.subr.mxu0 %v10859_v52 }
 0x29b   : > { %9598 = vmatprep.mubr.f32.mxu1 %v6598_v12  ;;  %v6599_v4 = vsub.f32 %v6526_v59, %v6598_v12  ;;  %v6610_v61 = vand.u32 4294901760, %v6609_v2 }
 0x29c   : > { %9599 = vmatmul.mubr.f32.vlgmr.msra.gmra.mxu1 %v6608_v58 }
 0x29d   : > { %v4432_v8 = vpop.xlane.xlu1 %4431  ;;  %9609 = vmatpush3.msra.mxu1 %v10842_v30  ;;  %v6600_v22 = vand.u32 4294901760, %v6599_v4  ;;  %v6611_v19 = vsub.f32 %v6609_v2, %v6610_v61 }
 0x29e   : > { %9848 = vrcp.f32 %v4432_v8  ;;  %9610 = vmatprep.subr.mxu1 %v10851_v36 }
 0x29f   : > { %9611 = vmatpush3.msra.mxu1 %v10851_v36  ;;  %9612 = vmatprep.mubr.f32.mxu1 %v6600_v22  ;;  %v4429_v21 = vpop.xlane.xlu0 %4428  ;;  %v6601_v23 = vsub.f32 %v6599_v4, %v6600_v22  ;;  %v6612_v27 = vand.u32 4294901760, %v6611_v19 }
 0x2a0   : > { %9850 = vrcp.f32 %v4429_v21  ;;  %9613 = vmatmul.mubr.f32.vlgmr.msra.gmra.mxu1 %v6610_v61  ;;  %9622 = vmatprep.subr.mxu1 %v10842_v30 }
 0x2a1   : > { %9623 = vmatpush3.msra.mxu1 %v10842_v30  ;;  %9626 = vmatprep.mubr.f32.mxu1 %v6598_v12  ;;  %v6602_v25 = vand.u32 4294901760, %v6601_v23  ;;  %v7166_v30 = vand.u32 4294901760, %v7165_v38 }
 0x2a2   : > { %9624 = vmatprep.subr.mxu1 %v10851_v36 }
 0x2a3   : > { %9591 = vmatprep.mubr.f32.mxu0 %v6602_v25  ;;  %9625 = vmatpush3.msra.mxu1 %v10851_v36 }
 0x2a4   : > { %9592 = vmatmul.mubr.f32.vlgmr.msra.gmra.mxu0 %v6612_v27  ;;  %9627 = vmatmul.mubr.f32.vlgmr.msra.gmra.mxu1 %v6608_v58 }
 0x2a5   : > { %9602 = vmatpush3.msra.mxu0 %v10859_v52  ;;  %9605 = vmatprep.mubr.f32.mxu0 %v6599_v4 }
 0x2a6   : > { %9603 = vmatprep.subr.mxu0 %v10873_v47  ;;  %9636 = vmatprep.subr.mxu1 %v7159_v28 }
 0x2a7   : > { %9604 = vmatpush3.msra.mxu0 %v10873_v47  ;;  %9637 = vmatpush3.msra.mxu1 %v7159_v28  ;;  %v10976_v47 = vsub.f32 %v9873_v37, %v10956_v0 }
 0x2a8   : > { %9606 = vmatmul.mubr.f32.vlgmr.msra.gmra.mxu0 %v6609_v2  ;;  %9615 = vmatprep.subr.mxu0 %v10870_v1 }
 0x2a9   : > { %9616 = vmatpush3.msra.mxu0 %v10870_v1  ;;  %9619 = vmatprep.mubr.f32.mxu0 %v6598_v12  ;;  %v10973_v1 = vand.u32 4294901760, %v10964_v42 }
 0x2aa   : > { %9617 = vmatprep.subr.mxu0 %v10883_v45  ;;  %9638 = vmatprep.subr.mxu1 %v7166_v30 }
 0x2ab   : > { %v9849_v18 = vpop.eup %9848  ;;  %9618 = vmatpush3.msra.mxu0 %v10883_v45  ;;  %9639 = vmatpush3.msra.mxu1 %v7166_v30  ;;  %v7666_v53 = vsub.f32 %v10964_v42, %v10973_v1  ;;  %v10983_v45 = vand.u32 4294901760, %v10976_v47 }
 0x2ac   : > { %9620 = vmatmul.mubr.f32.vlgmr.msra.gmra.mxu0 %v6608_v58  ;;  %v4468_v39 = vmul.f32 %v9849_v18, %v10626_v20  ;;  %9650 = vmatprep.subr.mxu1 %v10898_v13 }
 0x2ad   : > { %v9851_v36 = vpop.eup %9850  ;;  %9629 = vmatprep.subr.mxu0 %v10898_v13  ;;  %v7667_v57 = vand.u32 4294901760, %v7666_v53  ;;  %v7673_v46 = vsub.f32 %v10976_v47, %v10983_v45 }
 0x2ae   : > { %v4466_v52 = vmul.f32 %v9851_v36, %v10630_v15  ;;  %4488 = vst.msk [vmem:[%s10668_s28 + $0x58] sm:$0xff] %vm4300_vm1, %v4468_v39  ;;  %v7037_v40 = vsel %vm4300_vm1, %v4468_v39, 0  ;;  %9630 = vmatpush3.msra.mxu0 %v10898_v13 }
 0x2af   : > { %v7116_v20 = vand.u32 4294901760, %v7037_v40  ;;  %9631 = vmatprep.subr.mxu0 %v10906_v5  ;;  %v7674_v11 = vand.u32 4294901760, %v7673_v46 }
 0x2b0   : > { %4487 = vst.msk [vmem:[%s10668_s28 + $0x50] sm:$0xff] %vm4300_vm1, %v4466_v52  ;;  %v7034_v54 = vsel %vm4300_vm1, %v4466_v52, 0  ;;  %9632 = vmatpush3.msra.mxu0 %v10906_v5 }
 0x2b1   : > { %v7106_v31 = vand.u32 4294901760, %v7034_v54  ;;  %v7117_v15 = vsub.f32 %v7037_v40, %v7116_v20  ;;  %9643 = vmatprep.subr.mxu0 %v10914_v10 }
 0x2b3   : > { %9640 = vmatprep.mubr.f32.mxu1 %v7106_v31  ;;  %v7107_v44 = vsub.f32 %v7034_v54, %v7106_v31  ;;  %v7118_v6 = vand.u32 4294901760, %v7117_v15 }
 0x2b4   : > { %9641 = vmatmul.mubr.f32.vlgmr.msra.gmra.mxu1 %v7116_v20 }
 0x2b5   : > { %v4438_v48 = vpop.xlane.xlu1 %4437  ;;  %9651 = vmatpush3.msra.mxu1 %v10898_v13  ;;  %v7108_v32 = vand.u32 4294901760, %v7107_v44  ;;  %v7119_v50 = vsub.f32 %v7117_v15, %v7118_v6 }
 0x2b6   : > { %9852 = vrcp.f32 %v4438_v48  ;;  %9652 = vmatprep.subr.mxu1 %v10906_v5 }
 0x2b7   : > { %9653 = vmatpush3.msra.mxu1 %v10906_v5  ;;  %9654 = vmatprep.mubr.f32.mxu1 %v7108_v32  ;;  %v4435_v55 = vpop.xlane.xlu0 %4434  ;;  %v7109_v7 = vsub.f32 %v7107_v44, %v7108_v32  ;;  %v7120_v9 = vand.u32 4294901760, %v7119_v50 }
 0x2b8   : > { %9854 = vrcp.f32 %v4435_v55  ;;  %9655 = vmatmul.mubr.f32.vlgmr.msra.gmra.mxu1 %v7118_v6  ;;  %9664 = vmatprep.subr.mxu1 %v10898_v13 }
 0x2b9   : > { %9665 = vmatpush3.msra.mxu1 %v10898_v13  ;;  %9668 = vmatprep.mubr.f32.mxu1 %v7106_v31  ;;  %v7110_v56 = vand.u32 4294901760, %v7109_v7  ;;  %v10998_v13 = vand.u32 4294901760, %v9874_v62 }
 0x2ba   : > { %9666 = vmatprep.subr.mxu1 %v10906_v5 }
 0x2bb   : > { %9633 = vmatprep.mubr.f32.mxu0 %v7110_v56  ;;  %9667 = vmatpush3.msra.mxu1 %v10906_v5  ;;  %v11006_v5 = vand.u32 4294901760, %v9875_v43 }
 0x2bc   : > { %9634 = vmatmul.mubr.f32.vlgmr.msra.gmra.mxu0 %v7120_v9  ;;  %9669 = vmatmul.mubr.f32.vlgmr.msra.gmra.mxu1 %v7116_v20 }
 0x2bd   : > { %9644 = vmatpush3.msra.mxu0 %v10914_v10  ;;  %9647 = vmatprep.mubr.f32.mxu0 %v7107_v44  ;;  %v11014_v10 = vsub.f32 %v9874_v62, %v10998_v13  ;;  %v11026_v2 = vsub.f32 %v9875_v43, %v11006_v5 }
 0x2be   : > { %9645 = vmatprep.subr.mxu0 %v10926_v16  ;;  %9678 = vmatprep.subr.mxu1 %v7667_v57 }
 0x2bf   : > { %9646 = vmatpush3.msra.mxu0 %v10926_v16  ;;  %9679 = vmatpush3.msra.mxu1 %v7667_v57  ;;  %v11023_v12 = vand.u32 4294901760, %v11014_v10  ;;  %v11033_v19 = vand.u32 4294901760, %v11026_v2 }
 0x2c0   : > { %9648 = vmatmul.mubr.f32.vlgmr.msra.gmra.mxu0 %v7117_v15  ;;  %9657 = vmatprep.subr.mxu0 %v10923_v14 }
 0x2c1   : > { %9658 = vmatpush3.msra.mxu0 %v10923_v14  ;;  %9661 = vmatprep.mubr.f32.mxu0 %v7106_v31  ;;  %v8174_v22 = vsub.f32 %v11014_v10, %v11023_v12  ;;  %v8181_v27 = vsub.f32 %v11026_v2, %v11033_v19 }
 0x2c2   : > { %9659 = vmatprep.subr.mxu0 %v10933_v17  ;;  %9680 = vmatprep.subr.mxu1 %v7674_v11 }
 0x2c3   : > { %v9853_v41 = vpop.eup %9852  ;;  %9660 = vmatpush3.msra.mxu0 %v10933_v17  ;;  %9681 = vmatpush3.msra.mxu1 %v7674_v11  ;;  %v8175_v25 = vand.u32 4294901760, %v8174_v22  ;;  %v8182_v28 = vand.u32 4294901760, %v8181_v27 }
 0x2c4   : > { %9662 = vmatmul.mubr.f32.vlgmr.msra.gmra.mxu0 %v7116_v20  ;;  %v4472_v51 = vmul.f32 %v9853_v41, %v10636_v24  ;;  %9692 = vmatprep.subr.mxu1 %v10948_v34 }
 0x2c5   : > { %v9855_v33 = vpop.eup %9854  ;;  %9671 = vmatprep.subr.mxu0 %v10948_v34 }
 0x2c6   : > { %v4470_v60 = vmul.f32 %v9855_v33, %v10640_v26  ;;  %4490 = vst.msk [vmem:[%s10668_s28 + $0x68] sm:$0xff] %vm4300_vm1, %v4472_v51  ;;  %v7545_v35 = vsel %vm4300_vm1, %v4472_v51, 0  ;;  %9672 = vmatpush3.msra.mxu0 %v10948_v34 }
 0x2c7   : > { %v7624_v24 = vand.u32 4294901760, %v7545_v35  ;;  %9673 = vmatprep.subr.mxu0 %v10956_v0 }
 0x2c8   : > { %4489 = vst.msk [vmem:[%s10668_s28 + $0x60] sm:$0xff] %vm4300_vm1, %v4470_v60  ;;  %v7542_v58 = vsel %vm4300_vm1, %v4470_v60, 0  ;;  %9674 = vmatpush3.msra.mxu0 %v10956_v0 }
 0x2c9   : > { %v7614_v59 = vand.u32 4294901760, %v7542_v58  ;;  %v7625_v26 = vsub.f32 %v7545_v35, %v7624_v24  ;;  %9685 = vmatprep.subr.mxu0 %v10964_v42 }
 0x2cb   : > { %9682 = vmatprep.mubr.f32.mxu1 %v7614_v59  ;;  %v7615_v14 = vsub.f32 %v7542_v58, %v7614_v59  ;;  %v7626_v16 = vand.u32 4294901760, %v7625_v26 }
 0x2cc   : > { %9683 = vmatmul.mubr.f32.vlgmr.msra.gmra.mxu1 %v7624_v24 }
 0x2cd   : > { %v4444_v4 = vpop.xlane.xlu1 %4443  ;;  %9693 = vmatpush3.msra.mxu1 %v10948_v34  ;;  %v7616_v61 = vand.u32 4294901760, %v7615_v14  ;;  %v7627_v8 = vsub.f32 %v7625_v26, %v7626_v16 }
 0x2ce   : > { %9856 = vrcp.f32 %v4444_v4  ;;  %9694 = vmatprep.subr.mxu1 %v10956_v0 }
 0x2cf   : > { %9695 = vmatpush3.msra.mxu1 %v10956_v0  ;;  %9696 = vmatprep.mubr.f32.mxu1 %v7616_v61  ;;  %v4441_v63 = vpop.xlane.xlu0 %4440  ;;  %v7617_v17 = vsub.f32 %v7615_v14, %v7616_v61  ;;  %v7628_v23 = vand.u32 4294901760, %v7627_v8 }
 0x2d0   : > { %9858 = vrcp.f32 %v4441_v63  ;;  %9697 = vmatmul.mubr.f32.vlgmr.msra.gmra.mxu1 %v7626_v16  ;;  %9706 = vmatprep.subr.mxu1 %v10948_v34 }
 0x2d1   : > { %9707 = vmatpush3.msra.mxu1 %v10948_v34  ;;  %9710 = vmatprep.mubr.f32.mxu1 %v7614_v59  ;;  %v7618_v21 = vand.u32 4294901760, %v7617_v17 }
 0x2d2   : > { %9708 = vmatprep.subr.mxu1 %v10956_v0 }
 0x2d3   : > { %9675 = vmatprep.mubr.f32.mxu0 %v7618_v21  ;;  %9709 = vmatpush3.msra.mxu1 %v10956_v0 }
 0x2d4   : > { %9676 = vmatmul.mubr.f32.vlgmr.msra.gmra.mxu0 %v7628_v23  ;;  %9711 = vmatmul.mubr.f32.vlgmr.msra.gmra.mxu1 %v7624_v24 }
 0x2d5   : > { %9686 = vmatpush3.msra.mxu0 %v10964_v42  ;;  %9689 = vmatprep.mubr.f32.mxu0 %v7615_v14 }
 0x2d6   : > { %9687 = vmatprep.subr.mxu0 %v10976_v47  ;;  %9720 = vmatprep.subr.mxu1 %v8175_v25 }
 0x2d7   : > { %9688 = vmatpush3.msra.mxu0 %v10976_v47  ;;  %9721 = vmatpush3.msra.mxu1 %v8175_v25 }
 0x2d8   : > { %9690 = vmatmul.mubr.f32.vlgmr.msra.gmra.mxu0 %v7625_v26  ;;  %9699 = vmatprep.subr.mxu0 %v10973_v1 }
 0x2d9   : > { %9700 = vmatpush3.msra.mxu0 %v10973_v1  ;;  %9703 = vmatprep.mubr.f32.mxu0 %v7614_v59 }
 0x2da   : > { %9701 = vmatprep.subr.mxu0 %v10983_v45  ;;  %9722 = vmatprep.subr.mxu1 %v8182_v28 }
 0x2db   : > { %v9857_v38 = vpop.eup %9856  ;;  %9702 = vmatpush3.msra.mxu0 %v10983_v45  ;;  %9723 = vmatpush3.msra.mxu1 %v8182_v28 }
 0x2dc   : > { %9704 = vmatmul.mubr.f32.vlgmr.msra.gmra.mxu0 %v7624_v24  ;;  %v4476_v30 = vmul.f32 %v9857_v38, %v10652_v3  ;;  %9734 = vmatprep.subr.mxu1 %v10998_v13 }
 0x2dd   : > { %v9859_v29 = vpop.eup %9858  ;;  %9713 = vmatprep.subr.mxu0 %v10998_v13 }
 0x2de   : > { %v4474_v34 = vmul.f32 %v9859_v29, %v10656_v49  ;;  %4492 = vst.msk [vmem:[%s10668_s28 + $0x78] sm:$0xff] %vm4300_vm1, %v4476_v30  ;;  %v8053_v18 = vsel %vm4300_vm1, %v4476_v30, 0  ;;  %9714 = vmatpush3.msra.mxu0 %v10998_v13 }
 0x2df   : > { %v8132_v39 = vand.u32 4294901760, %v8053_v18  ;;  %9715 = vmatprep.subr.mxu0 %v11006_v5 }
 0x2e0   : > { %4491 = vst.msk [vmem:[%s10668_s28 + $0x70] sm:$0xff] %vm4300_vm1, %v4474_v34  ;;  %v8050_v3 = vsel %vm4300_vm1, %v4474_v34, 0  ;;  %9716 = vmatpush3.msra.mxu0 %v11006_v5 }
 0x2e1   : > { %v8122_v36 = vand.u32 4294901760, %v8050_v3  ;;  %v8133_v37 = vsub.f32 %v8053_v18, %v8132_v39  ;;  %9727 = vmatprep.subr.mxu0 %v11014_v10 }
 0x2e3   : > { %9724 = vmatprep.mubr.f32.mxu1 %v8122_v36  ;;  %v8123_v49 = vsub.f32 %v8050_v3, %v8122_v36  ;;  %v8134_v0 = vand.u32 4294901760, %v8133_v37 }
 0x2e4   : > { %9725 = vmatmul.mubr.f32.vlgmr.msra.gmra.mxu1 %v8132_v39 }
 0x2e5   : > { %9735 = vmatpush3.msra.mxu1 %v10998_v13  ;;  %v8124_v52 = vand.u32 4294901760, %v8123_v49  ;;  %v8135_v40 = vsub.f32 %v8133_v37, %v8134_v0 }
 0x2e6   : > { %9736 = vmatprep.subr.mxu1 %v11006_v5 }
 0x2e7   : > { %9737 = vmatpush3.msra.mxu1 %v11006_v5  ;;  %9738 = vmatprep.mubr.f32.mxu1 %v8124_v52  ;;  %v8125_v42 = vsub.f32 %v8123_v49, %v8124_v52  ;;  %v8136_v54 = vand.u32 4294901760, %v8135_v40 }
 0x2e8   : > { %9739 = vmatmul.mubr.f32.vlgmr.msra.gmra.mxu1 %v8134_v0  ;;  %9748 = vmatprep.subr.mxu1 %v10998_v13 }
 0x2e9   : > { %9749 = vmatpush3.msra.mxu1 %v10998_v13  ;;  %9752 = vmatprep.mubr.f32.mxu1 %v8122_v36  ;;  %v8126_v20 = vand.u32 4294901760, %v8125_v42 }
 0x2ea   : > { %9750 = vmatprep.subr.mxu1 %v11006_v5 }
 0x2eb   : > { %9717 = vmatprep.mubr.f32.mxu0 %v8126_v20  ;;  %9751 = vmatpush3.msra.mxu1 %v11006_v5 }
 0x2ec   : > { %9718 = vmatmul.mubr.f32.vlgmr.msra.gmra.mxu0 %v8136_v54  ;;  %9753 = vmatmul.mubr.f32.vlgmr.msra.gmra.mxu1 %v8132_v39 }
 0x2ed   : > { %9728 = vmatpush3.msra.mxu0 %v11014_v10  ;;  %9731 = vmatprep.mubr.f32.mxu0 %v8123_v49 }
 0x2ee   : > { %9729 = vmatprep.subr.mxu0 %v11026_v2 }
 0x2ef   : > { %9730 = vmatpush3.msra.mxu0 %v11026_v2 }
 0x2f0   : > { %9741 = vmatprep.subr.mxu0 %v11023_v12  ;;  %9732 = vmatmul.mubr.f32.vlgmr.msra.gmra.mxu0 %v8133_v37 }
 0x2f1   : > { %9742 = vmatpush3.msra.mxu0 %v11023_v12  ;;  %9745 = vmatprep.mubr.f32.mxu0 %v8122_v36 }
 0x2f2   : > { %9743 = vmatprep.subr.mxu0 %v11033_v19 }
 0x2f3   : > { %9744 = vmatpush3.msra.mxu0 %v11033_v19 }
 0x2f4   : > { %9746 = vmatmul.mubr.f32.vlgmr.msra.gmra.mxu0 %v8132_v39 }
 0x30c   : > { %v9432_v31 = vpop.f32.mrf.mxu1 }
 0x30e   : > { %v4663_v15 = vpop.f32.mrf.mxu1 }
 0x310   : > { %v9446_v1 = vpop.f32.mrf.mxu1 }
 0x312   : > { %v4827_v47 = vpop.f32.mrf.mxu1 }
 0x314   : > { %v9425_v44 = vpop.f32.mrf.mxu0  ;;  %v9460_v6 = vpop.f32.mrf.mxu1 }
 0x315   : > { %v4670_v50 = vadd.f32 %v9432_v31, %v9425_v44 }
 0x316   : > { %v4572_v48 = vpop.f32.mrf.mxu0  ;;  %v4991_v32 = vpop.f32.mrf.mxu1 }
 0x317   : > { %v4664_v45 = vadd.f32 %v4663_v15, %v4572_v48 }
 0x319   : > { %v9439_v53 = vpop.f32.mrf.mxu0 }
 0x31a   : > { %v4753_v55 = vadd.f32 %v9439_v53, %v4670_v50  ;;  %v9474_v7 = vpop.f32.mrf.mxu1 }
 0x31b   : > { %v4745_v56 = vpop.f32.mrf.mxu0 }
 0x31c   : > { %v4746_v9 = vadd.f32 %v4745_v56, %v4664_v45  ;;  %v4836_v57 = vadd.f32 %v9446_v1, %v4753_v55  ;;  %v5171_v46 = vpop.f32.mrf.mxu1 }
 0x31e   : > { %v4828_v11 = vadd.f32 %v4827_v47, %v4746_v9 }
 0x31f   : > { %v9453_v62 = vpop.f32.mrf.mxu0 }
 0x320   : > { %v4919_v13 = vadd.f32 %v9453_v62, %v4836_v57  ;;  %v9488_v41 = vpop.f32.mrf.mxu1 }
 0x321   : > { %v4912_v51 = vpop.f32.mrf.mxu0 }
 0x322   : > { %v4998_v33 = vadd.f32 %v9460_v6, %v4919_v13  ;;  %v4913_v43 = vadd.f32 %v4912_v51, %v4828_v11  ;;  %v5335_v60 = vpop.f32.mrf.mxu1 }
 0x324   : > { %8558 = vst.msk [vmem:[%s11082_s3 + $0x8] sm:$0xff] %vm187_vm0, %v4998_v33  ;;  %v4992_v5 = vadd.f32 %v4991_v32, %v4913_v43 }
 0x325   : > { %v9467_v35 = vpop.f32.mrf.mxu0 }
 0x326   : > { %8557 = vst.msk [vmem:[%s11082_s3] sm:$0xff] %vm187_vm0, %v4992_v5  ;;  %v5178_v24 = vadd.f32 %v9474_v7, %v9467_v35  ;;  %v9502_v58 = vpop.f32.mrf.mxu1 }
 0x327   : > { %v5080_v10 = vpop.f32.mrf.mxu0 }
 0x328   : > { %v5172_v26 = vadd.f32 %v5171_v46, %v5080_v10  ;;  %v5499_v14 = vpop.f32.mrf.mxu1 }
 0x32a   : > { %v9481_v59 = vpop.f32.mrf.mxu0 }
 0x32b   : > { %v5261_v12 = vadd.f32 %v9481_v59, %v5178_v24 }
 0x32c   : > { %v5253_v2 = vpop.f32.mrf.mxu0 }
 0x32d   : > { %v5254_v16 = vadd.f32 %v5253_v2, %v5172_v26  ;;  %v5344_v4 = vadd.f32 %v9488_v41, %v5261_v12 }
 0x32e   : > { %v9495_v61 = vpop.f32.mrf.mxu0 }
 0x32f   : > { %v5427_v8 = vadd.f32 %v9495_v61, %v5344_v4  ;;  %v5336_v22 = vadd.f32 %v5335_v60, %v5254_v16  ;;  %v9516_v19 = vpop.f32.mrf.mxu1 }
 0x330   : > { %v5420_v63 = vpop.f32.mrf.mxu0 }
 0x331   : > { %v5506_v17 = vadd.f32 %v9502_v58, %v5427_v8  ;;  %v5421_v21 = vadd.f32 %v5420_v63, %v5336_v22  ;;  %v5679_v23 = vpop.f32.mrf.mxu1 }
 0x333   : > { %8560 = vst.msk [vmem:[%s11082_s3 + $0x18] sm:$0xff] %vm187_vm0, %v5506_v17  ;;  %v5500_v25 = vadd.f32 %v5499_v14, %v5421_v21  ;;  %v9530_v27 = vpop.f32.mrf.mxu1 }
 0x335   : > { %8559 = vst.msk [vmem:[%s11082_s3 + $0x10] sm:$0xff] %vm187_vm0, %v5500_v25  ;;  %v5843_v30 = vpop.f32.mrf.mxu1 }
 0x337   : > { %v9509_v28 = vpop.f32.mrf.mxu0 }
 0x338   : > { %v5686_v29 = vadd.f32 %v9516_v19, %v9509_v28  ;;  %v9544_v3 = vpop.f32.mrf.mxu1 }
 0x339   : > { %v5588_v38 = vpop.f32.mrf.mxu0 }
 0x33a   : > { %v5680_v18 = vadd.f32 %v5679_v23, %v5588_v38 }
 0x33c   : > { %v9523_v34 = vpop.f32.mrf.mxu0 }
 0x33d   : > { %v5769_v39 = vadd.f32 %v9523_v34, %v5686_v29 }
 0x33e   : > { %v5761_v36 = vpop.f32.mrf.mxu0 }
 0x33f   : > { %9889 = shalt.err (!%p9886_p3)
}
 0x340   : > { %s9890_s22 = scalar_lea.hbm %s11097_s8, 2048  ;;  %s9894_s25 = scalar_lea.hbm %s11169_s2, 4096 }
 0x341   : > { %p9891_p4 = scmp.ne.s32.totalorder %s11097_s8, %s9890_s22  ;;  %p9895_p9 = scmp.lt.s32.totalorder %s11097_s8, %s11169_s2 }
 0x342   : > { %p9896_p10 = scmp.lt.s32.totalorder %s9894_s25, %s9890_s22 }
 0x343   : > { %p9892_p7 = pnand %p9891_p4, %p9994_p5 }
 0x344   : > { %p9897_p11 = por %p9896_p10, %p9895_p9 }
 0x345   : > { %p9893_p8 = pneg %p9892_p7 }
 0x347   : > { %p9898_p12 = pnand %p9897_p11, %p9893_p8 }
 0x349   : > { %9901 = shalt.err (!%p9898_p12)
}
 0x34a   : > { %s9939_s28 = smov 128   ;;  %s9940_s29 = smov 8   ;;  %v5762_v37 = vadd.f32 %v5761_v36, %v5680_v18  ;;  %v5852_v49 = vadd.f32 %v9530_v27, %v5769_v39  ;;  %v9537_v0 = vpop.f32.mrf.mxu0  ;;  %v6007_v42 = vpop.f32.mrf.mxu1 }
 0x34b   : > { %9755 = dma.vmem_to_hbm [thread:$0]  (%p9994_p5), %s11099_s5, 2048, %s11097_s8, %s11103_s14, %s9939_s28, %s9939_s28, %s9940_s29  }
 0x34c   : > { %v5935_v52 = vadd.f32 %v9537_v0, %v5852_v49  ;;  %v5844_v40 = vadd.f32 %v5843_v30, %v5762_v37  ;;  %v5928_v20 = vpop.f32.mrf.mxu0  ;;  %v9558_v15 = vpop.f32.mrf.mxu1 }
 0x34e   : > { %v6014_v54 = vadd.f32 %v9544_v3, %v5935_v52  ;;  %v5929_v31 = vadd.f32 %v5928_v20, %v5844_v40  ;;  %v6187_v47 = vpop.f32.mrf.mxu1  ;;  %v9551_v6 = vpop.f32.mrf.mxu0 }
 0x34f   : > { %v6194_v32 = vadd.f32 %v9558_v15, %v9551_v6 }
 0x350   : > { %8562 = vst.msk [vmem:[%s11082_s3 + $0x28] sm:$0xff] %vm187_vm0, %v6014_v54  ;;  %v6008_v1 = vadd.f32 %v6007_v42, %v5929_v31  ;;  %v9572_v44 = vpop.f32.mrf.mxu1  ;;  %v6096_v48 = vpop.f32.mrf.mxu0 }
 0x351   : > { %v6188_v45 = vadd.f32 %v6187_v47, %v6096_v48 }
 0x352   : > { %8561 = vst.msk [vmem:[%s11082_s3 + $0x20] sm:$0xff] %vm187_vm0, %v6008_v1  ;;  %v6351_v50 = vpop.f32.mrf.mxu1  ;;  %v9565_v53 = vpop.f32.mrf.mxu0 }
 0x353   : > { %v6277_v55 = vadd.f32 %v9565_v53, %v6194_v32 }
 0x354   : > { %v6269_v7 = vpop.f32.mrf.mxu0  ;;  %v9586_v57 = vpop.f32.mrf.mxu1 }
 0x355   : > { %v6270_v56 = vadd.f32 %v6269_v7, %v6188_v45  ;;  %v6360_v9 = vadd.f32 %v9572_v44, %v6277_v55 }
 0x356   : > { %v9579_v46 = vpop.f32.mrf.mxu0  ;;  %v6515_v33 = vpop.f32.mrf.mxu1 }
 0x357   : > { %v6443_v11 = vadd.f32 %v9579_v46, %v6360_v9  ;;  %v6352_v62 = vadd.f32 %v6351_v50, %v6270_v56 }
 0x358   : > { %v6436_v13 = vpop.f32.mrf.mxu0 }
 0x359   : > { %v6522_v41 = vadd.f32 %v9586_v57, %v6443_v11  ;;  %v6437_v51 = vadd.f32 %v6436_v13, %v6352_v62 }
 0x35b   : > { %8564 = vst.msk [vmem:[%s11082_s3 + $0x38] sm:$0xff] %vm187_vm0, %v6522_v41  ;;  %v6516_v43 = vadd.f32 %v6515_v33, %v6437_v51 }
 0x35c   : > { %v9600_v5 = vpop.f32.mrf.mxu1 }
 0x35d   : > { %8563 = vst.msk [vmem:[%s11082_s3 + $0x30] sm:$0xff] %vm187_vm0, %v6516_v43 }
 0x35e   : > { %v6695_v60 = vpop.f32.mrf.mxu1 }
 0x360   : > { %v9614_v35 = vpop.f32.mrf.mxu1 }
 0x362   : > { %v6859_v59 = vpop.f32.mrf.mxu1 }
 0x364   : > { %v9593_v10 = vpop.f32.mrf.mxu0  ;;  %v9628_v61 = vpop.f32.mrf.mxu1 }
 0x365   : > { %v6702_v58 = vadd.f32 %v9600_v5, %v9593_v10 }
 0x366   : > { %v6604_v24 = vpop.f32.mrf.mxu0  ;;  %v7023_v23 = vpop.f32.mrf.mxu1 }
 0x367   : > { %v6696_v12 = vadd.f32 %v6695_v60, %v6604_v24 }
 0x368   : > { %v9607_v26 = vpop.f32.mrf.mxu0 }
 0x369   : > { %v6785_v2 = vadd.f32 %v9607_v26, %v6702_v58 }
 0x36a   : > { %v6777_v14 = vpop.f32.mrf.mxu0 }
 0x36b   : > { %v6778_v16 = vadd.f32 %v6777_v14, %v6696_v12  ;;  %v6868_v4 = vadd.f32 %v9614_v35, %v6785_v2 }
 0x36c   : > { %v9621_v8 = vpop.f32.mrf.mxu0 }
 0x36d   : > { %v6951_v22 = vadd.f32 %v9621_v8, %v6868_v4  ;;  %v6860_v19 = vadd.f32 %v6859_v59, %v6778_v16 }
 0x36e   : > { %v6944_v63 = vpop.f32.mrf.mxu0 }
 0x36f   : > { %v7030_v17 = vadd.f32 %v9628_v61, %v6951_v22  ;;  %v6945_v21 = vadd.f32 %v6944_v63, %v6860_v19 }
 0x371   : > { %8566 = vst.msk [vmem:[%s11082_s3 + $0x48] sm:$0xff] %vm187_vm0, %v7030_v17  ;;  %v7024_v25 = vadd.f32 %v7023_v23, %v6945_v21 }
 0x373   : > { %8565 = vst.msk [vmem:[%s11082_s3 + $0x40] sm:$0xff] %vm187_vm0, %v7024_v25 }
 0x374   : > { %v9642_v27 = vpop.f32.mrf.mxu1 }
 0x376   : > { %v7203_v28 = vpop.f32.mrf.mxu1 }
 0x378   : > { %v9656_v38 = vpop.f32.mrf.mxu1 }
 0x37a   : > { %v7367_v18 = vpop.f32.mrf.mxu1 }
 0x37c   : > { %v9635_v30 = vpop.f32.mrf.mxu0  ;;  %v9670_v52 = vpop.f32.mrf.mxu1 }
 0x37d   : > { %v7210_v34 = vadd.f32 %v9642_v27, %v9635_v30 }
 0x37e   : > { %v7112_v29 = vpop.f32.mrf.mxu0  ;;  %v7531_v1 = vpop.f32.mrf.mxu1 }
 0x37f   : > { %v7204_v3 = vadd.f32 %v7203_v28, %v7112_v29 }
 0x380   : > { %v9649_v39 = vpop.f32.mrf.mxu0 }
 0x381   : > { %v7293_v36 = vadd.f32 %v9649_v39, %v7210_v34 }
 0x382   : > { %v7285_v37 = vpop.f32.mrf.mxu0 }
 0x383   : > { %v7286_v49 = vadd.f32 %v7285_v37, %v7204_v3  ;;  %v7376_v0 = vadd.f32 %v9656_v38, %v7293_v36 }
 0x384   : > { %v9663_v40 = vpop.f32.mrf.mxu0 }
 0x385   : > { %v7459_v42 = vadd.f32 %v9663_v40, %v7376_v0  ;;  %v7368_v20 = vadd.f32 %v7367_v18, %v7286_v49 }
 0x386   : > { %v7452_v54 = vpop.f32.mrf.mxu0 }
 0x387   : > { %v7538_v31 = vadd.f32 %v9670_v52, %v7459_v42  ;;  %v7453_v15 = vadd.f32 %v7452_v54, %v7368_v20 }
 0x389   : > { %8568 = vst.msk [vmem:[%s11082_s3 + $0x58] sm:$0xff] %vm187_vm0, %v7538_v31  ;;  %v7532_v47 = vadd.f32 %v7531_v1, %v7453_v15 }
 0x38b   : > { %8567 = vst.msk [vmem:[%s11082_s3 + $0x50] sm:$0xff] %vm187_vm0, %v7532_v47 }
 0x38c   : > { %v9684_v44 = vpop.f32.mrf.mxu1 }
 0x38e   : > { %v7711_v6 = vpop.f32.mrf.mxu1 }
 0x390   : > { %v9698_v48 = vpop.f32.mrf.mxu1 }
 0x392   : > { %v7875_v45 = vpop.f32.mrf.mxu1 }
 0x394   : > { %v9677_v32 = vpop.f32.mrf.mxu0  ;;  %v9712_v11 = vpop.f32.mrf.mxu1 }
 0x395   : > { %v7718_v53 = vadd.f32 %v9684_v44, %v9677_v32 }
 0x396   : > { %v7620_v50 = vpop.f32.mrf.mxu0  ;;  %v8039_v5 = vpop.f32.mrf.mxu1 }
 0x397   : > { %v7712_v7 = vadd.f32 %v7711_v6, %v7620_v50 }
 0x398   : > { %v9691_v55 = vpop.f32.mrf.mxu0 }
 0x399   : > { %v7801_v56 = vadd.f32 %v9691_v55, %v7718_v53 }
 0x39a   : > { %v7793_v9 = vpop.f32.mrf.mxu0 }
 0x39b   : > { %v7794_v57 = vadd.f32 %v7793_v9, %v7712_v7  ;;  %v7884_v46 = vadd.f32 %v9698_v48, %v7801_v56 }
 0x39c   : > { %v9705_v62 = vpop.f32.mrf.mxu0 }
 0x39d   : > { %v7967_v13 = vadd.f32 %v9705_v62, %v7884_v46  ;;  %v7876_v41 = vadd.f32 %v7875_v45, %v7794_v57 }
 0x39e   : > { %v7960_v51 = vpop.f32.mrf.mxu0 }
 0x39f   : > { %v8046_v33 = vadd.f32 %v9712_v11, %v7967_v13  ;;  %v7961_v43 = vadd.f32 %v7960_v51, %v7876_v41 }
 0x3a1   : > { %8570 = vst.msk [vmem:[%s11082_s3 + $0x68] sm:$0xff] %vm187_vm0, %v8046_v33  ;;  %v8040_v60 = vadd.f32 %v8039_v5, %v7961_v43 }
 0x3a3   : > { %8569 = vst.msk [vmem:[%s11082_s3 + $0x60] sm:$0xff] %vm187_vm0, %v8040_v60 }
 0x3a4   : > { %v9726_v35 = vpop.f32.mrf.mxu1 }
 0x3a6   : > { %v8219_v10 = vpop.f32.mrf.mxu1 }
 0x3a8   : > { %v9740_v24 = vpop.f32.mrf.mxu1 }
 0x3aa   : > { %v8383_v12 = vpop.f32.mrf.mxu1 }
 0x3ac   : > { %v9719_v58 = vpop.f32.mrf.mxu0  ;;  %v9754_v22 = vpop.f32.mrf.mxu1 }
 0x3ad   : > { %v8226_v26 = vadd.f32 %v9726_v35, %v9719_v58 }
 0x3ae   : > { %v8128_v59 = vpop.f32.mrf.mxu0  ;;  %v8547_v27 = vpop.f32.mrf.mxu1 }
 0x3af   : > { %v8220_v14 = vadd.f32 %v8219_v10, %v8128_v59 }
 0x3b0   : > { %v9733_v2 = vpop.f32.mrf.mxu0 }
 0x3b1   : > { %v8309_v16 = vadd.f32 %v9733_v2, %v8226_v26 }
 0x3b2   : > { %v8301_v4 = vpop.f32.mrf.mxu0 }
 0x3b3   : > { %v8302_v61 = vadd.f32 %v8301_v4, %v8220_v14  ;;  %v8392_v8 = vadd.f32 %v9740_v24, %v8309_v16 }
 0x3b4   : > { %v9747_v19 = vpop.f32.mrf.mxu0 }
 0x3b5   : > { %v8475_v63 = vadd.f32 %v9747_v19, %v8392_v8  ;;  %v8384_v17 = vadd.f32 %v8383_v12, %v8302_v61 }
 0x3b6   : > { %v8468_v21 = vpop.f32.mrf.mxu0 }
 0x3b7   : > { %v8554_v23 = vadd.f32 %v9754_v22, %v8475_v63  ;;  %v8469_v25 = vadd.f32 %v8468_v21, %v8384_v17 }
 0x3b9   : > { %8572 = vst.msk [vmem:[%s11082_s3 + $0x78] sm:$0xff] %vm187_vm0, %v8554_v23  ;;  %v8548_v28 = vadd.f32 %v8547_v27, %v8469_v25 }
 0x3bb   : > { %8571 = vst.msk [vmem:[%s11082_s3 + $0x70] sm:$0xff] %vm187_vm0, %v8548_v28 }
 0x3bc PF: > { %p9761_p5 = scmp.ge.s32.totalorder %s9936_s12, 2  ;;  %s8618_s19 = sand.u32 1, %s9924_s9  }
 0x3bd   : > { %s8619_s30 = scalar_lea.sflag [#allocation3], %s8618_s19 }
 0x3be   : > { %p9758_p13 = pnand %p9761_p5, %p9998_p6 }
 0x3c0   : > { %p9759_p0 = pneg %p9758_p13 }
 0x3c2   : > { %9919 = dma.done.wait (%p9759_p0), %s8619_s30, 2048  }
 0x3c3   : > { %9921 = vsyncadd (%p9759_p0), %s8619_s30, 4294965248  ;;  %p13_p1 = scmp.ge.s32.totalorder %s9981_s15, 4   ;;  %s11172_s9 = smov %s9928_s10 }
 0x3c4   : > { %s11173_s10 = smov %s9932_s11  ;;  %s11174_s11 = smov %s9992_s18 }
 0x3c5   : > { %s11175_s12 = smov %s9981_s15  ;;  %15 = sbr.rel (!%p13_p1) target bundleno = 3 (0x3), region = 71 }
 0x3ca   :  { %8624 = vsyncpa [#allocation3], 1 }
 0x3cb   :  { %8626 = vsyncpa [#allocation3 + $0x1], 1 }

</bundles_post_ra>
